<compile_context>
chip_gen: v6e
topology: v6e:2x2x1
jax: 0.10.0
libtpu: 0.0.40
codegen_flags: <defaults>
</compile_context>

<pallas_src>
import functools

import jax
import jax.numpy as jnp
from jax import lax
from jax.experimental import pallas as pl
from jax.experimental.pallas import tpu as pltpu


# Scoped-VMEM budget: actual double-buffered working sets here are a few MiB;
# 48 MiB leaves headroom on v5e/v6e (128 MiB) and still fits v7x (64 MiB).
_VMEM_LIMIT = 48 * 1024 * 1024
_NEG_BIG = -1e30  # bias for padded vocab rows -> exp() underflows to 0 (fp32 path)


def _round_up(x, m):
    return (x + m - 1) // m * m


def _largest_tile(dim, granule, target):
    """Largest multiple of `granule` that divides `dim` and is <= target."""
    assert dim % granule == 0 and dim >= granule
    t = max(granule, (min(target, dim) // granule) * granule)
    while dim % t:
        t -= granule
    return t


# --------- tiled linear: bf16 MXU, fp32 acc, fused bias/ReLU/fake-quant ---------

def _linear_kernel(*refs, relu, quant):
    if quant:
        x_ref, w_ref, b_ref, sc_ref, zp_ref, mi_ref, o_ref, acc_ref = refs
    else:
        x_ref, w_ref, b_ref, o_ref, acc_ref = refs
    kk = pl.program_id(2)

    @pl.when(kk == 0)
    def _():  # bias folded into the accumulator init (no extra add per K step)
        acc_ref[...] = jnp.broadcast_to(b_ref[...].astype(jnp.float32),
                                        acc_ref.shape)

    w = w_ref[...]                                   # [tk, tn] bf16 (pre-transposed)
    if quant:
        # Fused fake_quantize: per-output-feature (column of [K,N]) asymmetric
        # quant-dequant applied to the weight tile on the fly.  The round/clip
        # VPU work hides under weight-DMA slack (this layer is weight-BW bound
        # at small M).  Stats/scales come from the frozen fp32 weight.
        wf = w.astype(jnp.float32)
        sc = sc_ref[...]                             # [1, tn]
        zp = zp_ref[...]                             # [1, tn]
        inv = pl.reciprocal(sc, approx=False)        # tn reciprocals, not tk*tn divides
        max_int = mi_ref[0, 0]                       # SMEM scalar: 2**RoundBit(bit)-1
        wq = (jnp.clip(jnp.round(wf * inv) + zp, 0.0, max_int) - zp) * sc
        w = wq.astype(jnp.bfloat16)

    acc_ref[...] += jnp.dot(x_ref[...], w, preferred_element_type=jnp.float32)

    @pl.when(kk == pl.num_programs(2) - 1)
    def _():
        r = acc_ref[...]
        if relu:                                     # fused epilogue
            r = jnp.maximum(r, 0.0)
        o_ref[...] = r.astype(o_ref.dtype)


def linear(x, w_t, b, *, relu=False, out_dtype=jnp.bfloat16,
           quant_scales=None, quant_zeros=None, quant_max_int=None,
           tm=512, tn=512, tk=1024):
    """x: [M_pad, K_pad] bf16; w_t: cached [K_pad, N_pad] bf16; b: [1, N_pad] f32."""
    m_pad, k_pad = x.shape
    k_pad2, n_pad = w_t.shape
    assert k_pad == k_pad2
    tm = _largest_tile(m_pad, 16, tm)     # bf16 packs 2 rows / sublane -> 16 granule
    tn = _largest_tile(n_pad, 128, tn)    # lane / MXU-output granule
    tk = _largest_tile(k_pad, 128, tk)
    # v7x has 2 TensorCores sharded over "parallel" grid axes: make sure the
    # (i, j) grid has >= 2 blocks at small M.  Prefer splitting N (no duplicate
    # weight streaming); fall back to splitting M (tiny weights only).
    if (m_pad // tm) * (n_pad // tn) < 2:
        if n_pad >= 2 * 128:
            tn = _largest_tile(n_pad, 128, n_pad // 2)
        elif m_pad >= 2 * 16:
            tm = _largest_tile(m_pad, 16, m_pad // 2)
    grid = (m_pad // tm, n_pad // tn, k_pad // tk)

    quant = quant_scales is not None
    in_specs = [pl.BlockSpec((tm, tk), lambda i, j, kk: (i, kk)),
                pl.BlockSpec((tk, tn), lambda i, j, kk: (kk, j)),
                pl.BlockSpec((1, tn), lambda i, j, kk: (0, j))]
    args = [x, w_t, b]
    if quant:
        in_specs += [pl.BlockSpec((1, tn), lambda i, j, kk: (0, j)),   # scales
                     pl.BlockSpec((1, tn), lambda i, j, kk: (0, j)),   # zeros
                     pl.BlockSpec(memory_space=pltpu.MemorySpace.SMEM)]  # max_int
        args += [quant_scales, quant_zeros, quant_max_int]

    return pl.pallas_call(
        functools.partial(_linear_kernel, relu=relu, quant=quant),
        out_shape=jax.ShapeDtypeStruct((m_pad, n_pad), out_dtype),
        grid=grid,
        in_specs=in_specs,
        out_specs=pl.BlockSpec((tm, tn), lambda i, j, kk: (i, j)),
        scratch_shapes=[pltpu.VMEM((tm, tn), jnp.float32)],
        compiler_params=pltpu.CompilerParams(
            dimension_semantics=("parallel", "parallel", "arbitrary"),
            vmem_limit_bytes=_VMEM_LIMIT),
    )(*args)


# ----- fused lm_head + log_softmax + target gather (tokens on the LANE axis) -----

def _head_logprob_kernel(xt_ref, w_ref, b_ref, tgt_ref, msk_ref, o_ref,
                         m_sc, l_sc, t_sc):
    j = pl.program_id(1)
    tv = w_ref.shape[0]

    @pl.when(j == 0)
    def _():
        m_sc[...] = jnp.full_like(m_sc, -jnp.inf)
        l_sc[...] = jnp.zeros_like(l_sc)
        t_sc[...] = jnp.zeros_like(t_sc)

    # logits^T for this vocab tile: [tv, tm]; tokens are on lanes so every
    # per-token read/write below is lane-dense (no width-1 masked vst/vld).
    logits = jnp.dot(w_ref[...], xt_ref[...],
                     preferred_element_type=jnp.float32) + b_ref[...]

    # Online logsumexp over the vocab (sublane) axis — flash-style running stats.
    m_prev = m_sc[...]
    m_new = jnp.maximum(m_prev, jnp.max(logits, axis=0, keepdims=True))   # [1, tm]
    l_sc[...] = (jnp.exp(m_prev - m_new) * l_sc[...]
                 + jnp.sum(jnp.exp(logits - m_new), axis=0, keepdims=True))
    m_sc[...] = m_new

    # Target-logit gather: each target id hits exactly one vocab tile.
    row = lax.broadcasted_iota(jnp.int32, logits.shape, 0) + j * tv
    t_sc[...] += jnp.sum(jnp.where(row == tgt_ref[...], logits, 0.0),
                         axis=0, keepdims=True)

    @pl.when(j == pl.num_programs(1) - 1)
    def _():
        lp = t_sc[...] - (m_sc[...] + jnp.log(l_sc[...]))   # gathered log_softmax
        o_ref[...] = lp * msk_ref[...]                      # masked per-token logprob


def head_seq_logprobs(x, head_w, head_b, input_ids, attention_mask,
                      *, tm=256, tv=512):
    """x: [M_pad, H_pad] bf16; head_w: cached [V_pad, H_pad] bf16; -> [B] logprobs."""
    B, S = input_ids.shape
    m = B * S
    m_pad, h_pad = x.shape
    v_pad = head_w.shape[0]
    tm = _largest_tile(m_pad, 128, tm)   # tokens ride the LANE axis -> 128 granule
    tv = _largest_tile(v_pad, 128, tv)   # cap tv on v7x if V/H grow (64 MiB VMEM)
    # NOTE: at toy M the token ("parallel") axis has a single 128-lane block, so
    # one v7x core idles on this kernel; at production token counts m_pad//tm >= 2.

    # Activations transposed once in glue (fuses under jit); at production sizes
    # fold this into the previous linear's epilogue instead.
    xt = x.T                                                      # [H_pad, M_pad]

    # Causal shift folded into targets/mask: position t predicts token t+1; the
    # last position of each sequence is masked.  No shifted-logits copy in HBM.
    tgt = jnp.concatenate(
        [input_ids[:, 1:], jnp.zeros((B, 1), jnp.int32)], axis=1).astype(jnp.int32)
    msk = jnp.concatenate(
        [attention_mask[:, 1:].astype(jnp.float32), jnp.zeros((B, 1), jnp.float32)],
        axis=1)
    tgt = jnp.pad(tgt.reshape(1, m), ((0, 0), (0, m_pad - m)))
    msk = jnp.pad(msk.reshape(1, m), ((0, 0), (0, m_pad - m)))

    token_lp = pl.pallas_call(
        _head_logprob_kernel,
        out_shape=jax.ShapeDtypeStruct((1, m_pad), jnp.float32),
        grid=(m_pad // tm, v_pad // tv),
        in_specs=[pl.BlockSpec((h_pad, tm), lambda i, j: (0, i)),   # x^T
                  pl.BlockSpec((tv, h_pad), lambda i, j: (j, 0)),   # head weight
                  pl.BlockSpec((tv, 1), lambda i, j: (j, 0)),       # head bias
                  pl.BlockSpec((1, tm), lambda i, j: (0, i)),       # targets (lane-dense)
                  pl.BlockSpec((1, tm), lambda i, j: (0, i))],      # mask (lane-dense)
        out_specs=pl.BlockSpec((1, tm), lambda i, j: (0, i)),       # lane-dense output
        scratch_shapes=[pltpu.VMEM((1, tm), jnp.float32),   # running max
                        pltpu.VMEM((1, tm), jnp.float32),   # running sumexp
                        pltpu.VMEM((1, tm), jnp.float32)],  # target logit
        compiler_params=pltpu.CompilerParams(
            dimension_semantics=("parallel", "arbitrary"),
            vmem_limit_bytes=_VMEM_LIMIT),
    )(xt, head_w, head_b, tgt, msk)
    return jnp.sum(token_lp[0, :m].reshape(B, S), axis=1)


# -------------------- one-time weight prep (frozen model) --------------------

def _prep_linear(w, b):
    """torch [N, K] Linear -> cached [K_pad, N_pad] bf16 MXU RHS + [1, N_pad] f32 bias."""
    n, k = w.shape
    n_pad, k_pad = _round_up(n, 128), _round_up(k, 128)
    w_t = jnp.pad(w, ((0, n_pad - n), (0, k_pad - k))).T.astype(jnp.bfloat16)
    b_p = jnp.pad(b.astype(jnp.float32), (0, n_pad - n)).reshape(1, n_pad)
    return w_t, b_p


def _prep_row_stats(w):
    """Per-row (dim=1) amax/amin of the frozen fp32 weight — computed ONCE.
    (w is frozen so min/max never change; only scales/zeros depend on `bit`.)
    Padding: rmax=1, rmin=0 so padded columns dequantize exactly to 0."""
    n = w.shape[0]
    n_pad = _round_up(n, 128)
    rmax = jnp.pad(w.max(axis=1), (0, n_pad - n), constant_values=1.0)
    rmin = jnp.pad(w.min(axis=1), (0, n_pad - n), constant_values=0.0)
    return (rmax.reshape(1, n_pad).astype(jnp.float32),
            rmin.reshape(1, n_pad).astype(jnp.float32))


def prepare_model(params):
    """One-time prep (analogous to loading the frozen HF model): every weight is
    padded / transposed / cast to the layout the kernels consume, so forwards do
    zero per-call HBM passes over weights in XLA glue."""
    h = params['lin1_w'].shape[1]
    v = params['head_w'].shape[0]
    h_pad, v_pad = _round_up(h, 128), _round_up(v, 128)
    lin1_wt, lin1_b = _prep_linear(params['lin1_w'], params['lin1_b'])
    lin2_wt, lin2_b = _prep_linear(params['lin2_w'], params['lin2_b'])
    head_w = jnp.pad(params['head_w'],
                     ((0, v_pad - v), (0, h_pad - h))).astype(jnp.bfloat16)
    head_b = jnp.pad(params['head_b'].astype(jnp.float32), (0, v_pad - v),
                     constant_values=_NEG_BIG).reshape(v_pad, 1)
    embed = jnp.pad(params['embed'], ((0, 0), (0, h_pad - h))).astype(jnp.bfloat16)
    return dict(
        embed=embed,
        lin_wt=(lin1_wt, lin2_wt), lin_b=(lin1_b, lin2_b),
        lin_rmax=(_prep_row_stats(params['lin1_w'])[0],
                  _prep_row_stats(params['lin2_w'])[0]),
        lin_rmin=(_prep_row_stats(params['lin1_w'])[1],
                  _prep_row_stats(params['lin2_w'])[1]),
        head_w=head_w, head_b=head_b)


# ------------------------- QuantWrapper forward (jitted) -------------------------

def model_seq_logprobs(prep, input_ids, attention_mask, quant=None):
    B, S = input_ids.shape
    m = B * S
    m_pad = _round_up(m, 128)            # token axis is lane-dense in the head
    x = jnp.take(prep['embed'], input_ids.reshape(-1), axis=0)   # gather (glue)
    x = jnp.pad(x, ((0, m_pad - m), (0, 0)))
    for li in range(2):
        if quant is not None and quant['idx'] == li:
            x = linear(x, prep['lin_wt'][li], prep['lin_b'][li], relu=True,
                       quant_scales=quant['scales'], quant_zeros=quant['zeros'],
                       quant_max_int=quant['max_int'])
        else:
            x = linear(x, prep['lin_wt'][li], prep['lin_b'][li], relu=True)
    # lm_head fused with log-softmax + target gather: [B,S,V] never hits HBM.
    return head_seq_logprobs(x, prep['head_w'], prep['head_b'],
                             input_ids, attention_mask)


@functools.partial(jax.jit, static_argnames=('quant_idx',))
def quant_wrapper_forward(prep, bit, input_ids, attention_mask, labels, quant_idx=0):
    # 1) original (frozen) model forward -> per-sequence log-probs
    orig_lp = model_seq_logprobs(prep, input_ids, attention_mask)
    # 2) forward with linear_modules[quant_idx] fake-quantized.  Only O(N)
    #    scales/zeros are computed here (stats precomputed, weights frozen);
    #    the quant-dequant itself is fused into the linear kernel's weight path.
    #    NOTE: quantization rounds the bf16-cached weight; 4-bit quant error
    #    dominates the bf16 representation error.
    rmax = prep['lin_rmax'][quant_idx]
    rmin = prep['lin_rmin'][quant_idx]
    bit_i = bit[quant_idx, 0]
    max_int = jnp.exp2(jnp.round(bit_i)) - 1.0                 # 2**RoundBit(bit) - 1
    scales = jnp.maximum(rmax - rmin, 1e-5) / max_int
    zeros = jnp.clip(-jnp.round(rmin / scales), 0.0, max_int)
    quant = dict(idx=quant_idx, scales=scales, zeros=zeros,
                 max_int=max_int.reshape(1, 1).astype(jnp.float32))
    q_lp = model_seq_logprobs(prep, input_ids, attention_mask, quant=quant)
    # 3) pairwise preference accuracy bookkeeping (scalar glue)
    gt = jnp.where(labels[0::2] == 1, 0, 1)
    orig_pred = jnp.where(orig_lp[0::2] < orig_lp[1::2], 1, 0)
    quant_pred = jnp.where(q_lp[0::2] < q_lp[1::2], 1, 0)
    return (0.0, jnp.sum(orig_pred == gt), jnp.sum(quant_pred == gt), gt.shape[0])


# --------------------------------- demo / main ---------------------------------

def init_params(key, vocab, hidden):
    ks = jax.random.split(key, 7)
    s = 0.1
    return dict(
        embed=jax.random.normal(ks[0], (vocab, hidden), jnp.float32) * s,
        lin1_w=jax.random.normal(ks[1], (hidden, hidden), jnp.float32) * s,
        lin1_b=jax.random.normal(ks[2], (hidden,), jnp.float32) * s,
        lin2_w=jax.random.normal(ks[3], (hidden, hidden), jnp.float32) * s,
        lin2_b=jax.random.normal(ks[4], (hidden,), jnp.float32) * s,
        head_w=jax.random.normal(ks[5], (vocab, hidden), jnp.float32) * s,
        head_b=jax.random.normal(ks[6], (vocab,), jnp.float32) * s,
    )


if __name__ == "__main__":
    # Small but lane-friendly shapes (lane dims >= 128). B must be even (pairwise eval).
    B, S, H, V = 4, 32, 128, 256
    key = jax.random.PRNGKey(0)
    kp, kid = jax.random.split(key)
    params = init_params(kp, V, H)
    prep = prepare_model(params)                      # one-time weight prep

    input_ids = jax.random.randint(kid, (B, S), 0, V, dtype=jnp.int32)
    attention_mask = jnp.ones((B, S), jnp.int32).at[1, -4:].set(0)
    labels = jnp.array([1, 0, 0, 1], jnp.int32)
    # one learnable bit-width per quantizable Linear (lin1, lin2), init_bit=4.0
    bit = 4.0 * jnp.ones((2, 1), jnp.float32)

    loss, orig_correct, quant_correct, total = quant_wrapper_forward(
        prep, bit, input_ids, attention_mask, labels, quant_idx=0)
    jax.block_until_ready((orig_correct, quant_correct))
    print("KERNEL_OK")
</pallas_src>

<mosaic_0001>
module attributes {stable_mosaic.version = 11 : i64} {
  func.func @_linear_kernel(%arg0: i32, %arg1: i32, %arg2: i32, %arg3: memref<64x128xbf16, #tpu.memory_space<vmem>>, %arg4: memref<128x128xbf16, #tpu.memory_space<vmem>>, %arg5: memref<1x128xf32, #tpu.memory_space<vmem>>, %arg6: memref<1x128xf32, #tpu.memory_space<vmem>>, %arg7: memref<1x128xf32, #tpu.memory_space<vmem>>, %arg8: memref<1x1xf32, #tpu.memory_space<smem>>, %arg9: memref<64x128xbf16, #tpu.memory_space<vmem>>, %arg10: memref<64x128xf32, #tpu.memory_space<vmem>>) attributes {dimension_semantics = [#tpu.dimension_semantics<parallel>, #tpu.dimension_semantics<parallel>, #tpu.dimension_semantics<arbitrary>], iteration_bounds = array<i64: 2, 1, 1>, scalar_prefetch = 0 : i64, scratch_operands = 1 : i64, tpu.core_type = #tpu.core_type<tc>, window_params = [{transform_indices = @transform_0, window_bounds = array<i64: 64, 128>}, {transform_indices = @transform_1, window_bounds = array<i64: 128, 128>}, {transform_indices = @transform_2, window_bounds = array<i64: 1, 128>}, {transform_indices = @transform_3, window_bounds = array<i64: 1, 128>}, {transform_indices = @transform_4, window_bounds = array<i64: 1, 128>}, {transform_indices = @transform_5, window_bounds = array<i64: 1, 1>}, {transform_indices = @transform_6, window_bounds = array<i64: 64, 128>}]} {
    %c0_i32 = arith.constant 0 : i32
    %0 = arith.cmpi eq, %arg2, %c0_i32 : i32
    %1 = arith.extui %0 : i1 to i32
    %c0_i32_0 = arith.constant 0 : i32
    %2 = arith.cmpi ne, %1, %c0_i32_0 : i32
    scf.if %2 {
      %c0_17 = arith.constant 0 : index
      %c0_18 = arith.constant 0 : index
      %31 = vector.load %arg5[%c0_17, %c0_18] : memref<1x128xf32, #tpu.memory_space<vmem>>, vector<1x128xf32>
      %32 = vector.shape_cast %31 : vector<1x128xf32> to vector<1x128xf32>
      %33 = vector.broadcast %32 : vector<1x128xf32> to vector<64x128xf32>
      %c0_19 = arith.constant 0 : index
      %c0_20 = arith.constant 0 : index
      %34 = vector.load %arg10[%c0_19, %c0_20] : memref<64x128xf32, #tpu.memory_space<vmem>>, vector<64x128xf32>
      tpu.vector_store %arg10[%c0_19, %c0_20], %33 {strides = array<i32>} : memref<64x128xf32, #tpu.memory_space<vmem>>, vector<64x128xf32>,
    } else {
    }
    %c0 = arith.constant 0 : index
    %c0_1 = arith.constant 0 : index
    %3 = vector.load %arg4[%c0, %c0_1] : memref<128x128xbf16, #tpu.memory_space<vmem>>, vector<128x128xbf16>
    %4 = arith.extf %3 : vector<128x128xbf16> to vector<128x128xf32>
    %c0_2 = arith.constant 0 : index
    %c0_3 = arith.constant 0 : index
    %5 = vector.load %arg6[%c0_2, %c0_3] : memref<1x128xf32, #tpu.memory_space<vmem>>, vector<1x128xf32>
    %c0_4 = arith.constant 0 : index
    %c0_5 = arith.constant 0 : index
    %6 = vector.load %arg7[%c0_4, %c0_5] : memref<1x128xf32, #tpu.memory_space<vmem>>, vector<1x128xf32>
    %7 = tpu.reciprocal %5 : vector<1x128xf32> -> vector<1x128xf32>
    %c0_6 = arith.constant 0 : index
    %c0_7 = arith.constant 0 : index
    %8 = memref.load %arg8[%c0_6, %c0_7] : memref<1x1xf32, #tpu.memory_space<smem>>
    %9 = vector.broadcast %7 : vector<1x128xf32> to vector<128x128xf32>
    %10 = arith.mulf %4, %9 : vector<128x128xf32>
    %11 = math.roundeven %10 : vector<128x128xf32>
    %12 = vector.broadcast %6 : vector<1x128xf32> to vector<128x128xf32>
    %13 = arith.addf %11, %12 : vector<128x128xf32>
    %cst = arith.constant 0.000000e+00 : f32
    %14 = vector.broadcast %cst : f32 to vector<128x128xf32>
    %15 = arith.maximumf %14, %13 : vector<128x128xf32>
    %16 = vector.broadcast %8 : f32 to vector<128x128xf32>
    %17 = arith.minimumf %16, %15 : vector<128x128xf32>
    %18 = vector.broadcast %6 : vector<1x128xf32> to vector<128x128xf32>
    %19 = arith.subf %17, %18 : vector<128x128xf32>
    %20 = vector.broadcast %5 : vector<1x128xf32> to vector<128x128xf32>
    %21 = arith.mulf %19, %20 : vector<128x128xf32>
    %22 = arith.truncf %21 : vector<128x128xf32> to vector<128x128xbf16>
    %c0_8 = arith.constant 0 : index
    %c0_9 = arith.constant 0 : index
    %23 = vector.load %arg10[%c0_8, %c0_9] : memref<64x128xf32, #tpu.memory_space<vmem>>, vector<64x128xf32>
    %c0_10 = arith.constant 0 : index
    %c0_11 = arith.constant 0 : index
    %24 = vector.load %arg3[%c0_10, %c0_11] : memref<64x128xbf16, #tpu.memory_space<vmem>>, vector<64x128xbf16>
    %cst_12 = arith.constant dense<0.000000e+00> : vector<64x128xf32>
    %25 = tpu.matmul %24, %22, %cst_12 {dimension_numbers = #tpu.dot_dimension_numbers<[1], [0], [0], [1], [0, 0, 1, 1], [], []>} : vector<64x128xbf16>, vector<128x128xbf16>, vector<64x128xf32> -> vector<64x128xf32>
    %26 = arith.addf %23, %25 : vector<64x128xf32>
    %c0_13 = arith.constant 0 : index
    %c0_14 = arith.constant 0 : index
    %27 = vector.load %arg10[%c0_13, %c0_14] : memref<64x128xf32, #tpu.memory_space<vmem>>, vector<64x128xf32>
    tpu.vector_store %arg10[%c0_13, %c0_14], %26 {strides = array<i32>} : memref<64x128xf32, #tpu.memory_space<vmem>>, vector<64x128xf32>,
    %c0_i32_15 = arith.constant 0 : i32
    %28 = arith.cmpi eq, %arg2, %c0_i32_15 : i32
    %29 = arith.extui %28 : i1 to i32
    %c0_i32_16 = arith.constant 0 : i32
    %30 = arith.cmpi ne, %29, %c0_i32_16 : i32
    scf.if %30 {
      %c0_17 = arith.constant 0 : index
      %c0_18 = arith.constant 0 : index
      %31 = vector.load %arg10[%c0_17, %c0_18] : memref<64x128xf32, #tpu.memory_space<vmem>>, vector<64x128xf32>
      %cst_19 = arith.constant 0.000000e+00 : f32
      %32 = vector.broadcast %cst_19 : f32 to vector<64x128xf32>
      %33 = arith.maximumf %31, %32 : vector<64x128xf32>
      %34 = arith.truncf %33 : vector<64x128xf32> to vector<64x128xbf16>
      %c0_20 = arith.constant 0 : index
      %c0_21 = arith.constant 0 : index
      %35 = vector.load %arg9[%c0_20, %c0_21] : memref<64x128xbf16, #tpu.memory_space<vmem>>, vector<64x128xbf16>
      tpu.vector_store %arg9[%c0_20, %c0_21], %34 {strides = array<i32>} : memref<64x128xbf16, #tpu.memory_space<vmem>>, vector<64x128xbf16>,
    } else {
    }
    return
  }
  func.func @transform_0(%arg0: i32, %arg1: i32, %arg2: i32) -> (i32, i32) {
    %c0_i32 = arith.constant 0 : i32
    return %arg0, %arg2 : i32, i32
  }
  func.func @transform_1(%arg0: i32, %arg1: i32, %arg2: i32) -> (i32, i32) {
    %c0_i32 = arith.constant 0 : i32
    return %arg2, %arg1 : i32, i32
  }
  func.func @transform_2(%arg0: i32, %arg1: i32, %arg2: i32) -> (i32, i32) {
    %c0_i32 = arith.constant 0 : i32
    %c0_i32_0 = arith.constant 0 : i32
    return %c0_i32, %arg1 : i32, i32
  }
  func.func @transform_3(%arg0: i32, %arg1: i32, %arg2: i32) -> (i32, i32) {
    %c0_i32 = arith.constant 0 : i32
    %c0_i32_0 = arith.constant 0 : i32
    return %c0_i32, %arg1 : i32, i32
  }
  func.func @transform_4(%arg0: i32, %arg1: i32, %arg2: i32) -> (i32, i32) {
    %c0_i32 = arith.constant 0 : i32
    %c0_i32_0 = arith.constant 0 : i32
    return %c0_i32, %arg1 : i32, i32
  }
  func.func @transform_5(%arg0: i32, %arg1: i32, %arg2: i32) -> (i32, i32) {
    %c0_i32 = arith.constant 0 : i32
    %c0_i32_0 = arith.constant 0 : i32
    %c0_i32_1 = arith.constant 0 : i32
    return %c0_i32, %c0_i32_0 : i32, i32
  }
  func.func @transform_6(%arg0: i32, %arg1: i32, %arg2: i32) -> (i32, i32) {
    %c0_i32 = arith.constant 0 : i32
    return %arg0, %arg1 : i32, i32
  }
}

module attributes {stable_mosaic.version = 11 : i64} {
  func.func @_linear_kernel(%arg0: i32, %arg1: i32, %arg2: i32, %arg3: memref<64x128xbf16, #tpu.memory_space<vmem>>, %arg4: memref<128x128xbf16, #tpu.memory_space<vmem>>, %arg5: memref<1x128xf32, #tpu.memory_space<vmem>>, %arg6: memref<64x128xbf16, #tpu.memory_space<vmem>>, %arg7: memref<64x128xf32, #tpu.memory_space<vmem>>) attributes {dimension_semantics = [#tpu.dimension_semantics<parallel>, #tpu.dimension_semantics<parallel>, #tpu.dimension_semantics<arbitrary>], iteration_bounds = array<i64: 2, 1, 1>, scalar_prefetch = 0 : i64, scratch_operands = 1 : i64, tpu.core_type = #tpu.core_type<tc>, window_params = [{transform_indices = @transform_0, window_bounds = array<i64: 64, 128>}, {transform_indices = @transform_1, window_bounds = array<i64: 128, 128>}, {transform_indices = @transform_2, window_bounds = array<i64: 1, 128>}, {transform_indices = @transform_3, window_bounds = array<i64: 64, 128>}]} {
    %c0_i32 = arith.constant 0 : i32
    %0 = arith.cmpi eq, %arg2, %c0_i32 : i32
    %1 = arith.extui %0 : i1 to i32
    %c0_i32_0 = arith.constant 0 : i32
    %2 = arith.cmpi ne, %1, %c0_i32_0 : i32
    scf.if %2 {
      %c0_10 = arith.constant 0 : index
      %c0_11 = arith.constant 0 : index
      %12 = vector.load %arg5[%c0_10, %c0_11] : memref<1x128xf32, #tpu.memory_space<vmem>>, vector<1x128xf32>
      %13 = vector.shape_cast %12 : vector<1x128xf32> to vector<1x128xf32>
      %14 = vector.broadcast %13 : vector<1x128xf32> to vector<64x128xf32>
      %c0_12 = arith.constant 0 : index
      %c0_13 = arith.constant 0 : index
      %15 = vector.load %arg7[%c0_12, %c0_13] : memref<64x128xf32, #tpu.memory_space<vmem>>, vector<64x128xf32>
      tpu.vector_store %arg7[%c0_12, %c0_13], %14 {strides = array<i32>} : memref<64x128xf32, #tpu.memory_space<vmem>>, vector<64x128xf32>,
    } else {
    }
    %c0 = arith.constant 0 : index
    %c0_1 = arith.constant 0 : index
    %3 = vector.load %arg4[%c0, %c0_1] : memref<128x128xbf16, #tpu.memory_space<vmem>>, vector<128x128xbf16>
    %c0_2 = arith.constant 0 : index
    %c0_3 = arith.constant 0 : index
    %4 = vector.load %arg7[%c0_2, %c0_3] : memref<64x128xf32, #tpu.memory_space<vmem>>, vector<64x128xf32>
    %c0_4 = arith.constant 0 : index
    %c0_5 = arith.constant 0 : index
    %5 = vector.load %arg3[%c0_4, %c0_5] : memref<64x128xbf16, #tpu.memory_space<vmem>>, vector<64x128xbf16>
    %cst = arith.constant dense<0.000000e+00> : vector<64x128xf32>
    %6 = tpu.matmul %5, %3, %cst {dimension_numbers = #tpu.dot_dimension_numbers<[1], [0], [0], [1], [0, 0, 1, 1], [], []>} : vector<64x128xbf16>, vector<128x128xbf16>, vector<64x128xf32> -> vector<64x128xf32>
    %7 = arith.addf %4, %6 : vector<64x128xf32>
    %c0_6 = arith.constant 0 : index
    %c0_7 = arith.constant 0 : index
    %8 = vector.load %arg7[%c0_6, %c0_7] : memref<64x128xf32, #tpu.memory_space<vmem>>, vector<64x128xf32>
    tpu.vector_store %arg7[%c0_6, %c0_7], %7 {strides = array<i32>} : memref<64x128xf32, #tpu.memory_space<vmem>>, vector<64x128xf32>,
    %c0_i32_8 = arith.constant 0 : i32
    %9 = arith.cmpi eq, %arg2, %c0_i32_8 : i32
    %10 = arith.extui %9 : i1 to i32
    %c0_i32_9 = arith.constant 0 : i32
    %11 = arith.cmpi ne, %10, %c0_i32_9 : i32
    scf.if %11 {
      %c0_10 = arith.constant 0 : index
      %c0_11 = arith.constant 0 : index
      %12 = vector.load %arg7[%c0_10, %c0_11] : memref<64x128xf32, #tpu.memory_space<vmem>>, vector<64x128xf32>
      %cst_12 = arith.constant 0.000000e+00 : f32
      %13 = vector.broadcast %cst_12 : f32 to vector<64x128xf32>
      %14 = arith.maximumf %12, %13 : vector<64x128xf32>
      %15 = arith.truncf %14 : vector<64x128xf32> to vector<64x128xbf16>
      %c0_13 = arith.constant 0 : index
      %c0_14 = arith.constant 0 : index
      %16 = vector.load %arg6[%c0_13, %c0_14] : memref<64x128xbf16, #tpu.memory_space<vmem>>, vector<64x128xbf16>
      tpu.vector_store %arg6[%c0_13, %c0_14], %15 {strides = array<i32>} : memref<64x128xbf16, #tpu.memory_space<vmem>>, vector<64x128xbf16>,
    } else {
    }
    return
  }
  func.func @transform_0(%arg0: i32, %arg1: i32, %arg2: i32) -> (i32, i32) {
    %c0_i32 = arith.constant 0 : i32
    return %arg0, %arg2 : i32, i32
  }
  func.func @transform_1(%arg0: i32, %arg1: i32, %arg2: i32) -> (i32, i32) {
    %c0_i32 = arith.constant 0 : i32
    return %arg2, %arg1 : i32, i32
  }
  func.func @transform_2(%arg0: i32, %arg1: i32, %arg2: i32) -> (i32, i32) {
    %c0_i32 = arith.constant 0 : i32
    %c0_i32_0 = arith.constant 0 : i32
    return %c0_i32, %arg1 : i32, i32
  }
  func.func @transform_3(%arg0: i32, %arg1: i32, %arg2: i32) -> (i32, i32) {
    %c0_i32 = arith.constant 0 : i32
    return %arg0, %arg1 : i32, i32
  }
}

module attributes {stable_mosaic.version = 11 : i64} {
  func.func @_head_logprob_kernel(%arg0: i32, %arg1: i32, %arg2: memref<128x128xbf16, #tpu.memory_space<vmem>>, %arg3: memref<256x128xbf16, #tpu.memory_space<vmem>>, %arg4: memref<256x1xf32, #tpu.memory_space<vmem>>, %arg5: memref<1x128xi32, #tpu.memory_space<vmem>>, %arg6: memref<1x128xf32, #tpu.memory_space<vmem>>, %arg7: memref<1x128xf32, #tpu.memory_space<vmem>>, %arg8: memref<1x128xf32, #tpu.memory_space<vmem>>, %arg9: memref<1x128xf32, #tpu.memory_space<vmem>>, %arg10: memref<1x128xf32, #tpu.memory_space<vmem>>) attributes {dimension_semantics = [#tpu.dimension_semantics<parallel>, #tpu.dimension_semantics<arbitrary>], iteration_bounds = array<i64: 1, 1>, scalar_prefetch = 0 : i64, scratch_operands = 3 : i64, tpu.core_type = #tpu.core_type<tc>, window_params = [{transform_indices = @transform_0, window_bounds = array<i64: 128, 128>}, {transform_indices = @transform_1, window_bounds = array<i64: 256, 128>}, {transform_indices = @transform_2, window_bounds = array<i64: 256, 1>}, {transform_indices = @transform_3, window_bounds = array<i64: 1, 128>}, {transform_indices = @transform_4, window_bounds = array<i64: 1, 128>}, {transform_indices = @transform_5, window_bounds = array<i64: 1, 128>}]} {
    %c0_i32 = arith.constant 0 : i32
    %0 = arith.cmpi eq, %arg1, %c0_i32 : i32
    %1 = arith.extui %0 : i1 to i32
    %c0_i32_0 = arith.constant 0 : i32
    %2 = arith.cmpi ne, %1, %c0_i32_0 : i32
    scf.if %2 {
      %cst_26 = arith.constant 0xFF800000 : f32
      %42 = vector.broadcast %cst_26 : f32 to vector<1x128xf32>
      %c0_27 = arith.constant 0 : index
      %c0_28 = arith.constant 0 : index
      %43 = vector.load %arg8[%c0_27, %c0_28] : memref<1x128xf32, #tpu.memory_space<vmem>>, vector<1x128xf32>
      tpu.vector_store %arg8[%c0_27, %c0_28], %42 {strides = array<i32>} : memref<1x128xf32, #tpu.memory_space<vmem>>, vector<1x128xf32>,
      %cst_29 = arith.constant 0.000000e+00 : f32
      %44 = vector.broadcast %cst_29 : f32 to vector<1x128xf32>
      %c0_30 = arith.constant 0 : index
      %c0_31 = arith.constant 0 : index
      %45 = vector.load %arg9[%c0_30, %c0_31] : memref<1x128xf32, #tpu.memory_space<vmem>>, vector<1x128xf32>
      tpu.vector_store %arg9[%c0_30, %c0_31], %44 {strides = array<i32>} : memref<1x128xf32, #tpu.memory_space<vmem>>, vector<1x128xf32>,
      %cst_32 = arith.constant 0.000000e+00 : f32
      %46 = vector.broadcast %cst_32 : f32 to vector<1x128xf32>
      %c0_33 = arith.constant 0 : index
      %c0_34 = arith.constant 0 : index
      %47 = vector.load %arg10[%c0_33, %c0_34] : memref<1x128xf32, #tpu.memory_space<vmem>>, vector<1x128xf32>
      tpu.vector_store %arg10[%c0_33, %c0_34], %46 {strides = array<i32>} : memref<1x128xf32, #tpu.memory_space<vmem>>, vector<1x128xf32>,
    } else {
    }
    %c0 = arith.constant 0 : index
    %c0_1 = arith.constant 0 : index
    %3 = vector.load %arg3[%c0, %c0_1] : memref<256x128xbf16, #tpu.memory_space<vmem>>, vector<256x128xbf16>
    %c0_2 = arith.constant 0 : index
    %c0_3 = arith.constant 0 : index
    %4 = vector.load %arg2[%c0_2, %c0_3] : memref<128x128xbf16, #tpu.memory_space<vmem>>, vector<128x128xbf16>
    %cst = arith.constant dense<0.000000e+00> : vector<256x128xf32>
    %5 = tpu.matmul %3, %4, %cst {dimension_numbers = #tpu.dot_dimension_numbers<[1], [0], [0], [1], [0, 0, 1, 1], [], []>} : vector<256x128xbf16>, vector<128x128xbf16>, vector<256x128xf32> -> vector<256x128xf32>
    %c0_4 = arith.constant 0 : index
    %c0_5 = arith.constant 0 : index
    %6 = vector.load %arg4[%c0_4, %c0_5] : memref<256x1xf32, #tpu.memory_space<vmem>>, vector<256x1xf32>
    %7 = vector.broadcast %6 : vector<256x1xf32> to vector<256x128xf32>
    %8 = arith.addf %5, %7 : vector<256x128xf32>
    %c0_6 = arith.constant 0 : index
    %c0_7 = arith.constant 0 : index
    %9 = vector.load %arg8[%c0_6, %c0_7] : memref<1x128xf32, #tpu.memory_space<vmem>>, vector<1x128xf32>
    %cst_8 = arith.constant dense<0xFF800000> : vector<128xf32>
    %10 = vector.multi_reduction <maximumf>, %8, %cst_8 [0] : vector<256x128xf32> to vector<128xf32>
    %11 = vector.shape_cast %10 : vector<128xf32> to vector<1x128xf32>
    %12 = arith.maximumf %9, %11 : vector<1x128xf32>
    %13 = arith.subf %9, %12 : vector<1x128xf32>
    %14 = math.exp %13 : vector<1x128xf32>
    %c0_9 = arith.constant 0 : index
    %c0_10 = arith.constant 0 : index
    %15 = vector.load %arg9[%c0_9, %c0_10] : memref<1x128xf32, #tpu.memory_space<vmem>>, vector<1x128xf32>
    %16 = arith.mulf %14, %15 : vector<1x128xf32>
    %17 = vector.broadcast %12 : vector<1x128xf32> to vector<256x128xf32>
    %18 = arith.subf %8, %17 : vector<256x128xf32>
    %19 = math.exp %18 : vector<256x128xf32>
    %cst_11 = arith.constant dense<0.000000e+00> : vector<128xf32>
    %20 = vector.multi_reduction <add>, %19, %cst_11 [0] : vector<256x128xf32> to vector<128xf32>
    %21 = vector.shape_cast %20 : vector<128xf32> to vector<1x128xf32>
    %22 = arith.addf %16, %21 : vector<1x128xf32>
    %c0_12 = arith.constant 0 : index
    %c0_13 = arith.constant 0 : index
    %23 = vector.load %arg9[%c0_12, %c0_13] : memref<1x128xf32, #tpu.memory_space<vmem>>, vector<1x128xf32>
    tpu.vector_store %arg9[%c0_12, %c0_13], %22 {strides = array<i32>} : memref<1x128xf32, #tpu.memory_space<vmem>>, vector<1x128xf32>,
    %c0_14 = arith.constant 0 : index
    %c0_15 = arith.constant 0 : index
    %24 = vector.load %arg8[%c0_14, %c0_15] : memref<1x128xf32, #tpu.memory_space<vmem>>, vector<1x128xf32>
    tpu.vector_store %arg8[%c0_14, %c0_15], %12 {strides = array<i32>} : memref<1x128xf32, #tpu.memory_space<vmem>>, vector<1x128xf32>,
    %25 = tpu.iota {dimensions = array<i32: 0>} : vector<256x128xi32>
    %c256_i32 = arith.constant 256 : i32
    %26 = arith.muli %arg1, %c256_i32 : i32
    %27 = vector.broadcast %26 : i32 to vector<256x128xi32>
    %28 = arith.addi %25, %27 : vector<256x128xi32>
    %c0_16 = arith.constant 0 : index
    %c0_17 = arith.constant 0 : index
    %29 = vector.load %arg10[%c0_16, %c0_17] : memref<1x128xf32, #tpu.memory_space<vmem>>, vector<1x128xf32>
    %c0_18 = arith.constant 0 : index
    %c0_19 = arith.constant 0 : index
    %30 = vector.load %arg5[%c0_18, %c0_19] : memref<1x128xi32, #tpu.memory_space<vmem>>, vector<1x128xi32>
    %31 = vector.broadcast %30 : vector<1x128xi32> to vector<256x128xi32>
    %32 = arith.cmpi eq, %28, %31 : vector<256x128xi32>
    %cst_20 = arith.constant 0.000000e+00 : f32
    %33 = vector.broadcast %cst_20 : f32 to vector<256x128xf32>
    %34 = arith.select %32, %8, %33 : vector<256x128xi1>, vector<256x128xf32>
    %cst_21 = arith.constant dense<0.000000e+00> : vector<128xf32>
    %35 = vector.multi_reduction <add>, %34, %cst_21 [0] : vector<256x128xf32> to vector<128xf32>
    %36 = vector.shape_cast %35 : vector<128xf32> to vector<1x128xf32>
    %37 = arith.addf %29, %36 : vector<1x128xf32>
    %c0_22 = arith.constant 0 : index
    %c0_23 = arith.constant 0 : index
    %38 = vector.load %arg10[%c0_22, %c0_23] : memref<1x128xf32, #tpu.memory_space<vmem>>, vector<1x128xf32>
    tpu.vector_store %arg10[%c0_22, %c0_23], %37 {strides = array<i32>} : memref<1x128xf32, #tpu.memory_space<vmem>>, vector<1x128xf32>,
    %c0_i32_24 = arith.constant 0 : i32
    %39 = arith.cmpi eq, %arg1, %c0_i32_24 : i32
    %40 = arith.extui %39 : i1 to i32
    %c0_i32_25 = arith.constant 0 : i32
    %41 = arith.cmpi ne, %40, %c0_i32_25 : i32
    scf.if %41 {
      %c0_26 = arith.constant 0 : index
      %c0_27 = arith.constant 0 : index
      %42 = vector.load %arg10[%c0_26, %c0_27] : memref<1x128xf32, #tpu.memory_space<vmem>>, vector<1x128xf32>
      %c0_28 = arith.constant 0 : index
      %c0_29 = arith.constant 0 : index
      %43 = vector.load %arg8[%c0_28, %c0_29] : memref<1x128xf32, #tpu.memory_space<vmem>>, vector<1x128xf32>
      %c0_30 = arith.constant 0 : index
      %c0_31 = arith.constant 0 : index
      %44 = vector.load %arg9[%c0_30, %c0_31] : memref<1x128xf32, #tpu.memory_space<vmem>>, vector<1x128xf32>
      %45 = math.log %44 : vector<1x128xf32>
      %46 = arith.addf %43, %45 : vector<1x128xf32>
      %47 = arith.subf %42, %46 : vector<1x128xf32>
      %c0_32 = arith.constant 0 : index
      %c0_33 = arith.constant 0 : index
      %48 = vector.load %arg6[%c0_32, %c0_33] : memref<1x128xf32, #tpu.memory_space<vmem>>, vector<1x128xf32>
      %49 = arith.mulf %47, %48 : vector<1x128xf32>
      %c0_34 = arith.constant 0 : index
      %c0_35 = arith.constant 0 : index
      %50 = vector.load %arg7[%c0_34, %c0_35] : memref<1x128xf32, #tpu.memory_space<vmem>>, vector<1x128xf32>
      tpu.vector_store %arg7[%c0_34, %c0_35], %49 {strides = array<i32>} : memref<1x128xf32, #tpu.memory_space<vmem>>, vector<1x128xf32>,
    } else {
    }
    return
  }
  func.func @transform_0(%arg0: i32, %arg1: i32) -> (i32, i32) {
    %c0_i32 = arith.constant 0 : i32
    %c0_i32_0 = arith.constant 0 : i32
    return %c0_i32, %arg0 : i32, i32
  }
  func.func @transform_1(%arg0: i32, %arg1: i32) -> (i32, i32) {
    %c0_i32 = arith.constant 0 : i32
    %c0_i32_0 = arith.constant 0 : i32
    return %arg1, %c0_i32 : i32, i32
  }
  func.func @transform_2(%arg0: i32, %arg1: i32) -> (i32, i32) {
    %c0_i32 = arith.constant 0 : i32
    %c0_i32_0 = arith.constant 0 : i32
    return %arg1, %c0_i32 : i32, i32
  }
  func.func @transform_3(%arg0: i32, %arg1: i32) -> (i32, i32) {
    %c0_i32 = arith.constant 0 : i32
    %c0_i32_0 = arith.constant 0 : i32
    return %c0_i32, %arg0 : i32, i32
  }
  func.func @transform_4(%arg0: i32, %arg1: i32) -> (i32, i32) {
    %c0_i32 = arith.constant 0 : i32
    %c0_i32_0 = arith.constant 0 : i32
    return %c0_i32, %arg0 : i32, i32
  }
  func.func @transform_5(%arg0: i32, %arg1: i32) -> (i32, i32) {
    %c0_i32 = arith.constant 0 : i32
    %c0_i32_0 = arith.constant 0 : i32
    return %c0_i32, %arg0 : i32, i32
  }
}

</mosaic_0001>

<bundles_post_ra>
// kernel: squeeze.5
= control target key start
LH: loop header
LB: loop body
LE: loop exit
PB: predicated region body
PF: predicated region fallthrough
CT: control target
= control target key end

     0   :  { %s40_s8 = smov 32   ;;  %vm8_vm0 = vcmask 261120   ;;  %s41_s9 = smov 64   ;;  %s58_s0 = inlined_call_operand.vmem [shape: f32[128], index: 0, kind: input, shape index: {}]   ;;  %s59_s1 = inlined_call_operand.vmem [shape: f32[4,32], index: 1, kind: output, shape index: {}]  }
   0x1   :  { %v5_v0 = vld [vmem:[%s58_s0] sm:$0x1]  ;;  %s39_s0 = smov 96  }
   0x2   :  { %6 = vst [vmem:[#allocation1] sm:$0x1] %v5_v0 }
   0x9   :  { %v10_v1 = vld [vmem:[#allocation1] sm:$0x1]  }
   0xa   :  { %v22_v2 = vld [vmem:[#allocation1] sm:$0x1]   ;;  %11 = vrot.lane.b32.xlu0 %v10_v1, %s39_s0 }
   0xb   :  { %23 = vrot.lane.b32.xlu1 %v22_v2, %s40_s8  ;;  %v7_v3 = vld [vmem:[#allocation1] sm:$0x1]  }
   0xc   :  { %v16_v4 = vld [vmem:[#allocation1] sm:$0x1]   ;;  %9 = vst.msk [vmem:[#allocation0] sm:$0x1] %vm8_vm0, %v7_v3  }
   0xe   :  { %17 = vrot.lane.b32.xlu0 %v16_v4, %s41_s9 }
  0x7c   :  { %v12_v5 = vpop.permute.xlu0 %11  }
  0x7d   :  { %v24_v6 = vpop.permute.xlu1 %23   ;;  %15 = vst.msk [vmem:[#allocation0 + $0x1] sm:$0x1] %vm8_vm0, %v12_v5  }
  0x7e   :  { %27 = vst.msk [vmem:[#allocation0 + $0x3] sm:$0x1] %vm8_vm0, %v24_v6  }
  0x80   :  { %v18_v7 = vpop.permute.xlu0 %17  }
  0x81   :  { %21 = vst.msk [vmem:[#allocation0 + $0x2] sm:$0x1] %vm8_vm0, %v18_v7  }
  0x88   :  { %v32_v8 = vld [vmem:[#allocation0] sm:$0xf] }
  0x89   :  { %35 = vst [vmem:[%s59_s1] sm:$0xf] %v32_v8 }

// kernel: quant_wrapper_forward.6
= control target key start
LH: loop header
LB: loop body
LE: loop exit
PB: predicated region body
PF: predicated region fallthrough
CT: control target
= control target key end

     0   :  { %s831_s12 = smov 0   ;;  %s833_s13 = smov 0   ;;  %s904_s0 = inlined_call_operand.vmem [shape: bf16[128,128], index: 0, kind: input, shape index: {}]   ;;  %s905_s1 = inlined_call_operand.vmem [shape: bf16[128,128], index: 1, kind: input, shape index: {}]   ;;  %s906_s2 = inlined_call_operand.vmem [shape: f32[1,128], index: 2, kind: input, shape index: {}]   ;;  %s907_s3 = inlined_call_operand.vmem [shape: bf16[128,128], index: 3, kind: output, shape index: {}]  }
   0x1   :  { %s835_s14 = smov 0  }
   0x2 LB: > { %s32_s15 = sadd.s32 1, %s805_s13  ;;  %p640_p0 = scmp.ge.s32.totalorder %s809_s14, 1  ;;  %s809_s14 = sphi %s835_s14, %s13_s14   ;;  %s805_s13 = sphi %s833_s13, %s909_s13   ;;  %s801_s12 = sphi %s831_s12, %s908_s12  }
   0x3   : > { %p34_p1 = scmp.ge.s32.totalorder %s32_s15, 2  ;;  %p188_p2 = scmp.lt.s32.totalorder %s809_s14, 3 }
   0x5   : > { %s911_s15 = smov (%p34_p1, %s32_s15), 0  ;;  %p189_p3 = pnand %p640_p0, %p188_p2 }
   0x6   : > { %s641_s18 = sshll.u32 (!%p189_p3), %s801_s12, 3 }
   0x7   : > { %192 = sbr.rel (%p189_p3) target bundleno = 251 (0xfb), region = 32  ;;  %p230_p4 = scmp.lt.s32.totalorder (!%p189_p3), %s641_s18, 15 }
   0xc   : > { %v775_v0 = vld [vmem:[%s905_s1 + $0x38] sm:$0xff]   ;;  %v776_v1 = vld [vmem:[%s905_s1 + $0x30] sm:$0xff]   ;;  %s913_s18 = smov (!%p230_p4, %s641_s18), 15  ;;  %v777_v2 = vld [vmem:[%s905_s1 + $0x28] sm:$0xff]  }
   0xd   : > { %711 = vmatprep.subr.bf16.mxu0 %v775_v0  ;;  %735 = vmatprep.subr.bf16.mxu1 %v775_v0  ;;  %s642_s23 = sshll.u32 %s913_s18, 2  ;;  %v778_v3 = vld [vmem:[%s905_s1 + $0x20] sm:$0xff]   ;;  %v779_v6 = vld [vmem:[%s905_s1 + $0x18] sm:$0xff]   ;;  %v780_v7 = vld [vmem:[%s905_s1 + $0x10] sm:$0xff]  }
   0xe   : > { %712 = vmatpush3.bf16.msra.mxu0 %v775_v0  ;;  %743 = vmatpush3.bf16.msra.mxu1 %v775_v0  ;;  %s866_s26 = scalar_lea.vmem %s904_s0, %s642_s23  ;;  %v781_v8 = vld [vmem:[%s905_s1 + $0x8] sm:$0xff]   ;;  %v782_v9 = vld [vmem:[%s905_s1] sm:$0xff]   ;;  %s257_s17 = scalar_lea.vmem %s907_s3, %s642_s23 }
   0xf   : > { %713 = vmatprep.subr.bf16.mxu0 %v776_v1  ;;  %736 = vmatprep.subr.bf16.mxu1 %v776_v1  ;;  %v783_v4 = vld [vmem:[%s866_s26] sm:$0xff]   ;;  %v784_v5 = vld [vmem:[%s866_s26 + $0x10] sm:$0xff]   ;;  %v785_v10 = vld [vmem:[%s866_s26 + $0x8] sm:$0xff]  }
  0x10   : > { %727 = vmatprep.mubr.bf16.mxu0 %v783_v4  ;;  %731 = vmatprep.mubr.bf16.mxu1 %v784_v5  ;;  %v786_v11 = vld [vmem:[%s866_s26 + $0x18] sm:$0xff]   ;;  %v645_v12 = vld [vmem:[%s906_s2] ss:$0 sm:$0xff] }
  0x12   : > { %714 = vmatpush3.bf16.msra.mxu0 %v776_v1  ;;  %744 = vmatpush3.bf16.msra.mxu1 %v776_v1 }
  0x13   : > { %715 = vmatprep.subr.bf16.mxu0 %v777_v2  ;;  %737 = vmatprep.subr.bf16.mxu1 %v777_v2 }
  0x16   : > { %716 = vmatpush3.bf16.msra.mxu0 %v777_v2  ;;  %745 = vmatpush3.bf16.msra.mxu1 %v777_v2 }
  0x17   : > { %717 = vmatprep.subr.bf16.mxu0 %v778_v3  ;;  %738 = vmatprep.subr.bf16.mxu1 %v778_v3 }
  0x1a   : > { %718 = vmatpush3.bf16.msra.mxu0 %v778_v3  ;;  %746 = vmatpush3.bf16.msra.mxu1 %v778_v3 }
  0x1b   : > { %719 = vmatprep.subr.bf16.mxu0 %v779_v6  ;;  %739 = vmatprep.subr.bf16.mxu1 %v779_v6 }
  0x1e   : > { %720 = vmatpush3.bf16.msra.mxu0 %v779_v6  ;;  %747 = vmatpush3.bf16.msra.mxu1 %v779_v6 }
  0x1f   : > { %721 = vmatprep.subr.bf16.mxu0 %v780_v7  ;;  %740 = vmatprep.subr.bf16.mxu1 %v780_v7 }
  0x22   : > { %722 = vmatpush3.bf16.msra.mxu0 %v780_v7  ;;  %748 = vmatpush3.bf16.msra.mxu1 %v780_v7 }
  0x23   : > { %723 = vmatprep.subr.bf16.mxu0 %v781_v8  ;;  %741 = vmatprep.subr.bf16.mxu1 %v781_v8 }
  0x26   : > { %724 = vmatpush3.bf16.msra.mxu0 %v781_v8  ;;  %749 = vmatpush3.bf16.msra.mxu1 %v781_v8 }
  0x27   : > { %725 = vmatprep.subr.bf16.mxu0 %v782_v9  ;;  %742 = vmatprep.subr.bf16.mxu1 %v782_v9 }
  0x2a   : > { %726 = vmatpush3.bf16.msra.mxu0 %v782_v9  ;;  %750 = vmatpush3.bf16.msra.mxu1 %v782_v9 }
  0x2d   : > { %728 = vmatmul.mubr.bf16.vlgmr.msra.gmra.mxu0 %v785_v10  ;;  %732 = vmatmul.mubr.bf16.vlgmr.msra.gmra.mxu1 %v786_v11 }
  0xed   : > { %v729_v13 = vpop.f32.mrf.mxu0  ;;  %v733_v14 = vpop.f32.mrf.mxu1 }
  0xee   : > { %v450_v15 = vadd.f32 %v729_v13, %v645_v12  ;;  %v454_v16 = vadd.f32 %v733_v14, %v645_v12 }
  0xef   : > { %v417_v17 = vpop.f32.mrf.mxu0  ;;  %v433_v18 = vpop.f32.mrf.mxu1 }
  0xf0   : > { %v448_v19 = vadd.f32 %v645_v12, %v417_v17  ;;  %v452_v20 = vadd.f32 %v645_v12, %v433_v18  ;;  %v477_v25 = vmax.f32 %v450_v15, 0.0  ;;  %v481_v26 = vmax.f32 %v454_v16, 0.0 }
  0xf1   : > { %v730_v21 = vpop.f32.mrf.mxu0  ;;  %v734_v22 = vpop.f32.mrf.mxu1 }
  0xf2   : > { %v451_v23 = vadd.f32 %v730_v21, %v645_v12  ;;  %v455_v24 = vadd.f32 %v734_v22, %v645_v12  ;;  %v475_v33 = vmax.f32 %v448_v19, 0.0  ;;  %v479_v34 = vmax.f32 %v452_v20, 0.0 }
  0xf3   : > { %v420_v27 = vpop.f32.mrf.mxu0  ;;  %v436_v28 = vpop.f32.mrf.mxu1 }
  0xf4   : > { %v478_v29 = vmax.f32 %v451_v23, 0.0  ;;  %v482_v30 = vmax.f32 %v455_v24, 0.0  ;;  %v449_v31 = vadd.f32 %v645_v12, %v420_v27  ;;  %v453_v32 = vadd.f32 %v645_v12, %v436_v28 }
  0xf6   : > { %v684_v35 = vpack.c.bf16 %v478_v29, %v477_v25  ;;  %v694_v36 = vpack.c.bf16 %v482_v30, %v481_v26  ;;  %v476_v37 = vmax.f32 %v449_v31, 0.0  ;;  %v480_v38 = vmax.f32 %v453_v32, 0.0 }
  0xf8   : > { %696 = vst [vmem:[%s257_s17 + $0x8] sm:$0xff] %v684_v35   ;;  %698 = vst [vmem:[%s257_s17 + $0x18] sm:$0xff] %v694_v36   ;;  %v679_v39 = vpack.c.bf16 %v476_v37, %v475_v33  ;;  %v689_v40 = vpack.c.bf16 %v480_v38, %v479_v34 }
  0xfa   : > { %680 = vst [vmem:[%s257_s17] sm:$0xff] %v679_v39   ;;  %697 = vst [vmem:[%s257_s17 + $0x10] sm:$0xff] %v689_v40  }
  0xfb PF: > { %s13_s14 = sadd.s32 1, %s809_s14   ;;  %s908_s12 = smov %s805_s13 }
  0xfc   : > { %p10_p5 = scmp.ge.s32.totalorder %s13_s14, 4   ;;  %s909_s13 = smov %s911_s15 }
  0xfe   :  { %12 = sbr.rel (!%p10_p5) target bundleno = 2 (0x2), region = 76 }

// kernel: quant_wrapper_forward.9
= control target key start
LH: loop header
LB: loop body
LE: loop exit
PB: predicated region body
PF: predicated region fallthrough
CT: control target
= control target key end

     0   :  { %s1250_s23 = smov 0   ;;  %s1252_s24 = smov 0   ;;  %s1581_s0 = inlined_call_operand.vmem [shape: bf16[128,128], index: 0, kind: input, shape index: {}]   ;;  %s1582_s1 = inlined_call_operand.vmem [shape: bf16[128,128], index: 1, kind: input, shape index: {}]   ;;  %s1583_s2 = inlined_call_operand.vmem [shape: f32[1,128], index: 2, kind: input, shape index: {}]   ;;  %s1584_s3 = inlined_call_operand.vmem [shape: f32[1,128], index: 3, kind: input, shape index: {}]   ;;  %s1585_s4 = inlined_call_operand.vmem [shape: f32[1,128], index: 4, kind: input, shape index: {}]   ;;  %s1586_s5 = inlined_call_operand.<no memory space> [shape: f32[1,1], index: 5, kind: input, shape index: {}]   ;;  %s1587_s6 = inlined_call_operand.vmem [shape: bf16[128,128], index: 6, kind: output, shape index: {}]  }
   0x1   :  { %11 = sst [smem:[#allocation3]] %s1586_s5  ;;  %s1254_s25 = smov 0  }
   0x2 LB: > { %s36_s5 = sadd.s32 1, %s1206_s24  ;;  %p887_p0 = scmp.ge.s32.totalorder %s1210_s25, 1  ;;  %s1210_s25 = sphi %s1254_s25, %s17_s25   ;;  %s1206_s24 = sphi %s1252_s24, %s1619_s24   ;;  %s1202_s23 = sphi %s1250_s23, %s1618_s23  }
   0x3   : > { %p38_p1 = scmp.ge.s32.totalorder %s36_s5, 2  ;;  %p280_p2 = scmp.lt.s32.totalorder %s1210_s25, 3 }
   0x5   : > { %s1621_s5 = smov (%p38_p1, %s36_s5), 0  ;;  %p281_p3 = pnand %p887_p0, %p280_p2 }
   0x6   : > { %s888_s28 = sshll.u32 (!%p281_p3), %s1202_s23, 3  ;;  %s424_s30 = sld [smem:[#allocation3]] (!%p281_p3) }
   0x7   : > { %284 = sbr.rel (%p281_p3) target bundleno = 309 (0x135), region = 44  ;;  %p334_p4 = scmp.lt.s32.totalorder (!%p281_p3), %s888_s28, 15 }
   0xc   : > { %v421_v0 = vld [vmem:[%s1584_s3] sm:$0x1]  ;;  %v426_v1 = vlaneseq  ;;  %s1623_s28 = smov (!%p334_p4, %s888_s28), 15  ;;  %v974_v2 = vld [vmem:[%s1582_s1 + $0x38] sm:$0xff]   ;;  %v973_v6 = vld [vmem:[%s1582_s1 + $0x30] sm:$0xff]   ;;  %v1316_v27 = vstv %s424_s30 }
   0xd   : > { %1186 = vrcp.f32 %v421_v0  ;;  %s889_s29 = sshll.u32 %s1623_s28, 2  ;;  %v972_v7 = vld [vmem:[%s1582_s1 + $0x28] sm:$0xff]   ;;  %v971_v9 = vld [vmem:[%s1582_s1 + $0x20] sm:$0xff]   ;;  %v1298_v10 = vld [vmem:[%s1582_s1 + $0x18] sm:$0xff]   ;;  %v946_v11 = vunpack.c.l.bf16 %v974_v2  ;;  %v947_v13 = vunpack.c.h.bf16 %v974_v2  ;;  %v942_v14 = vunpack.c.l.bf16 %v973_v6 }
   0xe   : > { %s1279_s9 = scalar_lea.vmem %s1581_s0, %s889_s29  ;;  %v427_v3 = vshrl.u32 %v426_v1, 7  ;;  %v1303_v12 = vld [vmem:[%s1582_s1 + $0x10] sm:$0xff]   ;;  %v943_v15 = vunpack.c.h.bf16 %v973_v6  ;;  %v938_v16 = vunpack.c.l.bf16 %v972_v7  ;;  %v1308_v17 = vld [vmem:[%s1582_s1 + $0x8] sm:$0xff]   ;;  %v939_v19 = vunpack.c.h.bf16 %v972_v7  ;;  %v1359_v63 = vld [vmem:[%s1585_s4] ss:$0 sm:$0xff]  ;;  %s367_s12 = scalar_lea.vmem %s1587_s6, %s889_s29 }
   0xf   : > { %v1182_v4 = vld [vmem:[%s1279_s9] sm:$0xff]   ;;  %v1183_v5 = vld [vmem:[%s1279_s9 + $0x10] sm:$0xff]   ;;  %v934_v20 = vunpack.c.l.bf16 %v971_v9  ;;  %v935_v21 = vunpack.c.h.bf16 %v971_v9  ;;  %v930_v22 = vunpack.c.l.bf16 %v1298_v10  ;;  %v931_v24 = vunpack.c.h.bf16 %v1298_v10 }
  0x10   : > { %1006 = vmatprep.mubr.bf16.mxu0 %v1182_v4  ;;  %1010 = vmatprep.mubr.bf16.mxu1 %v1183_v5  ;;  %v428_v8 = vsub.s32 0, %v427_v3  ;;  %v926_v25 = vunpack.c.l.bf16 %v1303_v12  ;;  %v927_v26 = vunpack.c.h.bf16 %v1303_v12  ;;  %v922_v29 = vunpack.c.l.bf16 %v1308_v17 }
  0x11   : > { %v923_v30 = vunpack.c.h.bf16 %v1308_v17 }
  0x12   : > { %v1318_v28 = vrot.slane %v421_v0, %v428_v8 }
  0x1a   : > { %v1187_v18 = vpop.eup %1186 }
  0x1b   : > { %v1311_v23 = vrot.slane %v1187_v18, %v428_v8 }
  0x1d   : > { %v445_v31 = vmul.f32 %v946_v11, %v1311_v23  ;;  %v446_v32 = vmul.f32 %v947_v13, %v1311_v23  ;;  %v443_v33 = vmul.f32 %v942_v14, %v1311_v23  ;;  %v444_v34 = vmul.f32 %v943_v15, %v1311_v23 }
  0x1e   : > { %v1327_v35 = vmul.f32 %v938_v16, %v1311_v23  ;;  %v1330_v36 = vmul.f32 %v939_v19, %v1311_v23  ;;  %v1333_v37 = vmul.f32 %v934_v20, %v1311_v23  ;;  %v1336_v38 = vmul.f32 %v935_v21, %v1311_v23 }
  0x1f   : > { %v1142_v39 = vand.u32 2147483647, %v445_v31  ;;  %v1144_v40 = vcvt.f32.s32 %v445_v31  ;;  %v1147_v41 = vand.u32 2147483648, %v445_v31  ;;  %v1150_v42 = vand.u32 2147483647, %v446_v32 }
  0x20   : > { %v1152_v43 = vcvt.f32.s32 %v446_v32  ;;  %v1155_v44 = vand.u32 2147483648, %v446_v32  ;;  %v1126_v45 = vand.u32 2147483647, %v443_v33  ;;  %v1128_v46 = vcvt.f32.s32 %v443_v33 }
  0x21   : > { %vm1338_vm0 = vcmp.lt.f32.partialorder %v1142_v39, 8388608.0  ;;  %v1145_v48 = vcvt.s32.f32 %v1144_v40  ;;  %vm1342_vm1 = vcmp.lt.f32.partialorder %v1150_v42, 8388608.0  ;;  %v1131_v50 = vand.u32 2147483648, %v443_v33 }
  0x22   : > { %v1153_v51 = vcvt.s32.f32 %v1152_v43  ;;  %vm1346_vm2 = vcmp.lt.f32.partialorder %v1126_v45, 8388608.0  ;;  %v1129_v53 = vcvt.s32.f32 %v1128_v46  ;;  %v1134_v54 = vand.u32 2147483647, %v444_v34 }
  0x23   : > { %v1146_v55 = vand.u32 2147483647, %v1145_v48  ;;  %v1136_v56 = vcvt.f32.s32 %v444_v34  ;;  %v1139_v57 = vand.u32 2147483648, %v444_v34  ;;  %v1110_v58 = vand.u32 2147483647, %v1327_v35 }
  0x24   : > { %v1154_v59 = vand.u32 2147483647, %v1153_v51  ;;  %v1130_v60 = vand.u32 2147483647, %v1129_v53  ;;  %vm1351_vm3 = vcmp.lt.f32.partialorder %v1134_v54, 8388608.0  ;;  %v1112_v62 = vcvt.f32.s32 %v1327_v35 }
  0x25   : > { %v1148_v0 = vor.u32 %v1147_v41, %v1146_v55  ;;  %v1137_v1 = vcvt.s32.f32 %v1136_v56  ;;  %vm1361_vm4 = vcmp.lt.f32.partialorder %v1110_v58, 8388608.0  ;;  %v1115_v3 = vand.u32 2147483648, %v1327_v35 }
  0x26   : > { %v1156_v4 = vor.u32 %v1155_v44, %v1154_v59  ;;  %v1132_v5 = vor.u32 %v1131_v50, %v1130_v60  ;;  %v1113_v6 = vcvt.s32.f32 %v1112_v62  ;;  %v1118_v7 = vand.u32 2147483647, %v1330_v36 }
  0x27   : > { %v1149_v8 = vsel %vm1338_vm0, %v1148_v0, %v445_v31  ;;  %v1138_v9 = vand.u32 2147483647, %v1137_v1  ;;  %v1120_v11 = vcvt.f32.s32 %v1330_v36  ;;  %v1123_v13 = vand.u32 2147483648, %v1330_v36  ;;  %v1410_v0 = vld [vmem:[%s1582_s1] sm:$0xff]  }
  0x28   : > { %v1157_v14 = vsel %vm1342_vm1, %v1156_v4, %v446_v32  ;;  %v483_v15 = vadd.f32 %v1149_v8, %v1359_v63  ;;  %v1133_v16 = vsel %vm1346_vm2, %v1132_v5, %v443_v33  ;;  %v1114_v18 = vand.u32 2147483647, %v1113_v6 }
  0x29   : > { %v484_v19 = vadd.f32 %v1157_v14, %v1359_v63  ;;  %v1140_v20 = vor.u32 %v1139_v57, %v1138_v9  ;;  %v481_v21 = vadd.f32 %v1133_v16, %v1359_v63  ;;  %vm1378_vm5 = vcmp.lt.f32.partialorder %v1118_v7, 8388608.0 }
  0x2a   : > { %v499_v39 = vmax.f32 %v483_v15, 0.0  ;;  %v1116_v40 = vor.u32 %v1115_v3, %v1114_v18  ;;  %v1121_v41 = vcvt.s32.f32 %v1120_v11  ;;  %v1094_v32 = vand.u32 2147483647, %v1333_v37 }
  0x2b   : > { %v500_v42 = vmax.f32 %v484_v19, 0.0  ;;  %v1141_v43 = vsel %vm1351_vm3, %v1140_v20, %v444_v34  ;;  %v497_v33 = vmax.f32 %v481_v21, 0.0  ;;  %v1096_v44 = vcvt.f32.s32 %v1333_v37 }
  0x2c   : > { %v516_v45 = vmin.f32 %v1316_v27, %v499_v39  ;;  %v482_v46 = vadd.f32 %v1141_v43, %v1359_v63  ;;  %v1117_v47 = vsel %vm1361_vm4, %v1116_v40, %v1327_v35  ;;  %v1122_v48 = vand.u32 2147483647, %v1121_v41 }
  0x2d   : > { %v517_v49 = vmin.f32 %v1316_v27, %v500_v42  ;;  %v514_v50 = vmin.f32 %v1316_v27, %v497_v33  ;;  %v479_v51 = vadd.f32 %v1117_v47, %v1359_v63  ;;  %vm1394_vm6 = vcmp.lt.f32.partialorder %v1094_v32, 8388608.0 }
  0x2e   : > { %v532_v52 = vsub.f32 %v516_v45, %v1359_v63  ;;  %v498_v53 = vmax.f32 %v482_v46, 0.0  ;;  %v1124_v54 = vor.u32 %v1123_v13, %v1122_v48  ;;  %v1097_v55 = vcvt.s32.f32 %v1096_v44 }
  0x2f   : > { %v533_v56 = vsub.f32 %v517_v49, %v1359_v63  ;;  %v530_v35 = vsub.f32 %v514_v50, %v1359_v63  ;;  %v495_v57 = vmax.f32 %v479_v51, 0.0  ;;  %v1099_v58 = vand.u32 2147483648, %v1333_v37 }
  0x30   : > { %v554_v59 = vmul.f32 %v1318_v28, %v532_v52  ;;  %v515_v60 = vmin.f32 %v1316_v27, %v498_v53  ;;  %v1125_v61 = vsel %vm1378_vm5, %v1124_v54, %v1330_v36  ;;  %v1098_v62 = vand.u32 2147483647, %v1097_v55 }
  0x31   : > { %v555_v1 = vmul.f32 %v1318_v28, %v533_v56  ;;  %v552_v2 = vmul.f32 %v1318_v28, %v530_v35  ;;  %v480_v3 = vadd.f32 %v1125_v61, %v1359_v63  ;;  %v512_v4 = vmin.f32 %v1316_v27, %v495_v57 }
  0x32   : > { %v531_v5 = vsub.f32 %v515_v60, %v1359_v63  ;;  %v1100_v6 = vor.u32 %v1099_v58, %v1098_v62  ;;  %v1102_v7 = vand.u32 2147483647, %v1336_v38  ;;  %v1104_v36 = vcvt.f32.s32 %v1336_v38 }
  0x33   : > { %v563_v8 = vpack.c.bf16 %v555_v1, %v554_v59  ;;  %v496_v9 = vmax.f32 %v480_v3, 0.0  ;;  %v528_v11 = vsub.f32 %v512_v4, %v1359_v63  ;;  %v918_v13 = vunpack.c.l.bf16 %v1410_v0 }
  0x34   : > { %v553_v14 = vmul.f32 %v1318_v28, %v531_v5  ;;  %v1101_v15 = vsel %vm1394_vm6, %v1100_v6, %v1333_v37  ;;  %v1105_v16 = vcvt.s32.f32 %v1104_v36  ;;  %v1107_v18 = vand.u32 2147483648, %v1336_v38 }
  0x35   : > { %990 = vmatprep.subr.bf16.mxu0 %v563_v8  ;;  %1014 = vmatprep.subr.bf16.mxu1 %v563_v8  ;;  %v513_v19 = vmin.f32 %v1316_v27, %v496_v9  ;;  %vm1427_vm7 = vcmp.lt.f32.partialorder %v1102_v7, 8388608.0  ;;  %v477_v21 = vadd.f32 %v1101_v15, %v1359_v63  ;;  %v919_v31 = vunpack.c.h.bf16 %v1410_v0 }
  0x36   : > { %991 = vmatpush3.bf16.msra.mxu0 %v563_v8  ;;  %1022 = vmatpush3.bf16.msra.mxu1 %v563_v8  ;;  %v562_v39 = vpack.c.bf16 %v553_v14, %v552_v2  ;;  %v1106_v40 = vand.u32 2147483647, %v1105_v16  ;;  %v437_v37 = vmul.f32 %v930_v22, %v1311_v23  ;;  %v438_v41 = vmul.f32 %v931_v24, %v1311_v23 }
  0x37   : > { %v529_v32 = vsub.f32 %v513_v19, %v1359_v63  ;;  %v550_v42 = vmul.f32 %v1318_v28, %v528_v11  ;;  %v493_v43 = vmax.f32 %v477_v21, 0.0  ;;  %v1444_v33 = vmul.f32 %v926_v25, %v1311_v23 }
  0x38   : > { %992 = vmatprep.subr.bf16.mxu0 %v562_v39  ;;  %1015 = vmatprep.subr.bf16.mxu1 %v562_v39  ;;  %v1108_v44 = vor.u32 %v1107_v18, %v1106_v40  ;;  %v1078_v45 = vand.u32 2147483647, %v437_v37  ;;  %v1080_v46 = vcvt.f32.s32 %v437_v37  ;;  %v1449_v10 = vmul.f32 %v927_v26, %v1311_v23 }
  0x39   : > { %v551_v22 = vmul.f32 %v1318_v28, %v529_v32  ;;  %v510_v24 = vmin.f32 %v1316_v27, %v493_v43  ;;  %v1086_v47 = vand.u32 2147483647, %v438_v41  ;;  %v1088_v48 = vcvt.f32.s32 %v438_v41 }
  0x3a   : > { %993 = vmatpush3.bf16.msra.mxu0 %v562_v39  ;;  %1023 = vmatpush3.bf16.msra.mxu1 %v562_v39  ;;  %v1109_v25 = vsel %vm1427_vm7, %v1108_v44, %v1336_v38  ;;  %vm1456_vm8 = vcmp.lt.f32.partialorder %v1078_v45, 8388608.0  ;;  %v1081_v50 = vcvt.s32.f32 %v1080_v46  ;;  %v1083_v12 = vand.u32 2147483648, %v437_v37 }
  0x3b   : > { %v561_v26 = vpack.c.bf16 %v551_v22, %v550_v42  ;;  %v478_v51 = vadd.f32 %v1109_v25, %v1359_v63  ;;  %v526_v34 = vsub.f32 %v510_v24, %v1359_v63  ;;  %v1091_v52 = vand.u32 2147483648, %v438_v41 }
  0x3c   : > { %v1082_v53 = vand.u32 2147483647, %v1081_v50  ;;  %v1089_v54 = vcvt.s32.f32 %v1088_v48  ;;  %v1062_v55 = vand.u32 2147483647, %v1444_v33  ;;  %v1064_v56 = vcvt.f32.s32 %v1444_v33 }
  0x3d   : > { %994 = vmatprep.subr.bf16.mxu0 %v561_v26  ;;  %1016 = vmatprep.subr.bf16.mxu1 %v561_v26  ;;  %v494_v38 = vmax.f32 %v478_v51, 0.0  ;;  %v548_v35 = vmul.f32 %v1318_v28, %v526_v34  ;;  %vm1465_vm9 = vcmp.lt.f32.partialorder %v1086_v47, 8388608.0  ;;  %v1067_v58 = vand.u32 2147483648, %v1444_v33 }
  0x3e   : > { %995 = vmatpush3.bf16.msra.mxu0 %v561_v26  ;;  %1024 = vmatpush3.bf16.msra.mxu1 %v561_v26  ;;  %v1084_v59 = vor.u32 %v1083_v12, %v1082_v53  ;;  %v1090_v60 = vand.u32 2147483647, %v1089_v54  ;;  %v1065_v61 = vcvt.s32.f32 %v1064_v56  ;;  %v1070_v62 = vand.u32 2147483647, %v1449_v10 }
  0x3f   : > { %v511_v1 = vmin.f32 %v1316_v27, %v494_v38  ;;  %vm1472_vm10 = vcmp.lt.f32.partialorder %v1062_v55, 8388608.0  ;;  %v1072_v3 = vcvt.f32.s32 %v1449_v10  ;;  %v1075_v4 = vand.u32 2147483648, %v1449_v10 }
  0x40   : > { %v1085_v5 = vsel %vm1456_vm8, %v1084_v59, %v437_v37  ;;  %v1092_v6 = vor.u32 %v1091_v52, %v1090_v60  ;;  %v1066_v7 = vand.u32 2147483647, %v1065_v61  ;;  %v433_v36 = vmul.f32 %v922_v29, %v1311_v23 }
  0x41   : > { %v527_v8 = vsub.f32 %v511_v1, %v1359_v63  ;;  %v475_v9 = vadd.f32 %v1085_v5, %v1359_v63  ;;  %v1073_v11 = vcvt.s32.f32 %v1072_v3  ;;  %v1488_v14 = vmul.f32 %v923_v30, %v1311_v23 }
  0x42   : > { %v1093_v15 = vsel %vm1465_vm9, %v1092_v6, %v438_v41  ;;  %v1068_v16 = vor.u32 %v1067_v58, %v1066_v7  ;;  %v1046_v18 = vand.u32 2147483647, %v433_v36  ;;  %v1048_v19 = vcvt.f32.s32 %v433_v36 }
  0x43   : > { %v549_v20 = vmul.f32 %v1318_v28, %v527_v8  ;;  %v476_v29 = vadd.f32 %v1093_v15, %v1359_v63  ;;  %v491_v21 = vmax.f32 %v475_v9, 0.0  ;;  %v1074_v39 = vand.u32 2147483647, %v1073_v11 }
  0x44   : > { %v1069_v40 = vsel %vm1472_vm10, %v1068_v16, %v1444_v33  ;;  %vm1497_vm11 = vcmp.lt.f32.partialorder %v1070_v62, 8388608.0  ;;  %v1049_v30 = vcvt.s32.f32 %v1048_v19  ;;  %v1051_v37 = vand.u32 2147483648, %v433_v36 }
  0x45   : > { %v560_v41 = vpack.c.bf16 %v549_v20, %v548_v35  ;;  %v492_v32 = vmax.f32 %v476_v29, 0.0  ;;  %v508_v42 = vmin.f32 %v1316_v27, %v491_v21  ;;  %v1076_v43 = vor.u32 %v1075_v4, %v1074_v39 }
  0x46   : > { %v473_v44 = vadd.f32 %v1069_v40, %v1359_v63  ;;  %vm1503_vm12 = vcmp.lt.f32.partialorder %v1046_v18, 8388608.0  ;;  %v1050_v46 = vand.u32 2147483647, %v1049_v30  ;;  %v1056_v33 = vcvt.f32.s32 %v1488_v14 }
  0x47   : > { %996 = vmatprep.subr.bf16.mxu0 %v560_v41  ;;  %1017 = vmatprep.subr.bf16.mxu1 %v560_v41  ;;  %v509_v22 = vmin.f32 %v1316_v27, %v492_v32  ;;  %v524_v24 = vsub.f32 %v508_v42, %v1359_v63  ;;  %v1077_v47 = vsel %vm1497_vm11, %v1076_v43, %v1449_v10  ;;  %v1054_v48 = vand.u32 2147483647, %v1488_v14 }
  0x48   : > { %997 = vmatpush3.bf16.msra.mxu0 %v560_v41  ;;  %1025 = vmatpush3.bf16.msra.mxu1 %v560_v41  ;;  %v474_v25 = vadd.f32 %v1077_v47, %v1359_v63  ;;  %v489_v49 = vmax.f32 %v473_v44, 0.0  ;;  %v1052_v50 = vor.u32 %v1051_v37, %v1050_v46  ;;  %v1059_v12 = vand.u32 2147483648, %v1488_v14 }
  0x49   : > { %v525_v26 = vsub.f32 %v509_v22, %v1359_v63  ;;  %v546_v51 = vmul.f32 %v1318_v28, %v524_v24  ;;  %v1057_v34 = vcvt.s32.f32 %v1056_v33  ;;  %v431_v52 = vmul.f32 %v918_v13, %v1311_v23 }
  0x4a   : > { %v490_v10 = vmax.f32 %v474_v25, 0.0  ;;  %v506_v53 = vmin.f32 %v1316_v27, %v489_v49  ;;  %v1053_v54 = vsel %vm1503_vm12, %v1052_v50, %v433_v36  ;;  %v432_v35 = vmul.f32 %v919_v31, %v1311_v23  ;;  %v1184_v25 = vld [vmem:[%s1279_s9 + $0x8] sm:$0xff]   ;;  %v1185_v49 = vld [vmem:[%s1279_s9 + $0x18] sm:$0xff]  }
  0x4b   : > { %v547_v55 = vmul.f32 %v1318_v28, %v525_v26  ;;  %v1058_v56 = vand.u32 2147483647, %v1057_v34  ;;  %v471_v38 = vadd.f32 %v1053_v54, %v1359_v63  ;;  %vm1531_vm13 = vcmp.lt.f32.partialorder %v1054_v48, 8388608.0 }
  0x4c   : > { %v507_v57 = vmin.f32 %v1316_v27, %v490_v10  ;;  %v522_v58 = vsub.f32 %v506_v53, %v1359_v63  ;;  %v1032_v59 = vcvt.f32.s32 %v431_v52  ;;  %v1030_v1 = vand.u32 2147483647, %v431_v52 }
  0x4d   : > { %v559_v60 = vpack.c.bf16 %v547_v55, %v546_v51  ;;  %v1060_v61 = vor.u32 %v1059_v12, %v1058_v56  ;;  %v487_v62 = vmax.f32 %v471_v38, 0.0  ;;  %v1035_v0 = vand.u32 2147483648, %v431_v52 }
  0x4e   : > { %v523_v2 = vsub.f32 %v507_v57, %v1359_v63  ;;  %v544_v3 = vmul.f32 %v1318_v28, %v522_v58  ;;  %v1033_v4 = vcvt.s32.f32 %v1032_v59  ;;  %v1040_v5 = vcvt.f32.s32 %v432_v35 }
  0x4f   : > { %998 = vmatprep.subr.bf16.mxu0 %v559_v60  ;;  %1018 = vmatprep.subr.bf16.mxu1 %v559_v60  ;;  %v1061_v23 = vsel %vm1531_vm13, %v1060_v61, %v1488_v14  ;;  %v504_v31 = vmin.f32 %v1316_v27, %v487_v62  ;;  %v1038_v8 = vand.u32 2147483647, %v432_v35  ;;  %vm1543_vm14 = vcmp.lt.f32.partialorder %v1030_v1, 8388608.0 }
  0x50   : > { %999 = vmatpush3.bf16.msra.mxu0 %v559_v60  ;;  %1026 = vmatpush3.bf16.msra.mxu1 %v559_v60  ;;  %v545_v6 = vmul.f32 %v1318_v28, %v523_v2  ;;  %v472_v7 = vadd.f32 %v1061_v23, %v1359_v63  ;;  %v1034_v36 = vand.u32 2147483647, %v1033_v4  ;;  %v1041_v11 = vcvt.s32.f32 %v1040_v5 }
  0x51   : > { %v1043_v15 = vand.u32 2147483648, %v432_v35  ;;  %v520_v14 = vsub.f32 %v504_v31, %v1359_v63  ;;  %vm1039_vm15 = vcmp.lt.f32.partialorder %v1038_v8, 8388608.0 }
  0x52   : > { %v558_v16 = vpack.c.bf16 %v545_v6, %v544_v3  ;;  %v488_v18 = vmax.f32 %v472_v7, 0.0  ;;  %v1036_v19 = vor.u32 %v1035_v0, %v1034_v36  ;;  %v1042_v20 = vand.u32 2147483647, %v1041_v11 }
  0x53   : > { %v542_v30 = vmul.f32 %v1318_v28, %v520_v14 }
  0x54   : > { %1000 = vmatprep.subr.bf16.mxu0 %v558_v16  ;;  %1019 = vmatprep.subr.bf16.mxu1 %v558_v16  ;;  %v505_v29 = vmin.f32 %v1316_v27, %v488_v18  ;;  %v1037_v21 = vsel %vm1543_vm14, %v1036_v19, %v431_v52  ;;  %v1044_v39 = vor.u32 %v1043_v15, %v1042_v20 }
  0x55   : > { %1001 = vmatpush3.bf16.msra.mxu0 %v558_v16  ;;  %1027 = vmatpush3.bf16.msra.mxu1 %v558_v16  ;;  %v469_v40 = vadd.f32 %v1037_v21, %v1359_v63 }
  0x56   : > { %v521_v17 = vsub.f32 %v505_v29, %v1359_v63  ;;  %v1045_v37 = vsel %vm1039_vm15, %v1044_v39, %v432_v35 }
  0x57   : > { %v485_v41 = vmax.f32 %v469_v40, 0.0  ;;  %v470_v42 = vadd.f32 %v1045_v37, %v1359_v63 }
  0x58   : > { %v543_v32 = vmul.f32 %v1318_v28, %v521_v17 }
  0x59   : > { %v502_v43 = vmin.f32 %v1316_v27, %v485_v41  ;;  %v486_v45 = vmax.f32 %v470_v42, 0.0 }
  0x5a   : > { %v557_v44 = vpack.c.bf16 %v543_v32, %v542_v30 }
  0x5b   : > { %v518_v46 = vsub.f32 %v502_v43, %v1359_v63  ;;  %v503_v33 = vmin.f32 %v1316_v27, %v486_v45  ;;  %v892_v27 = vld [vmem:[%s1583_s2] ss:$0 sm:$0xff] }
  0x5c   : > { %1002 = vmatprep.subr.bf16.mxu0 %v557_v44  ;;  %1020 = vmatprep.subr.bf16.mxu1 %v557_v44 }
  0x5d   : > { %1003 = vmatpush3.bf16.msra.mxu0 %v557_v44  ;;  %1028 = vmatpush3.bf16.msra.mxu1 %v557_v44  ;;  %v519_v22 = vsub.f32 %v503_v33, %v1359_v63  ;;  %v540_v24 = vmul.f32 %v1318_v28, %v518_v46 }
  0x5f   : > { %v541_v47 = vmul.f32 %v1318_v28, %v519_v22 }
  0x61   : > { %v556_v48 = vpack.c.bf16 %v541_v47, %v540_v24 }
  0x63   : > { %1004 = vmatprep.subr.bf16.mxu0 %v556_v48  ;;  %1021 = vmatprep.subr.bf16.mxu1 %v556_v48 }
  0x64   : > { %1005 = vmatpush3.bf16.msra.mxu0 %v556_v48  ;;  %1029 = vmatpush3.bf16.msra.mxu1 %v556_v48 }
  0x67   : > { %1007 = vmatmul.mubr.bf16.vlgmr.msra.gmra.mxu0 %v1184_v25  ;;  %1011 = vmatmul.mubr.bf16.vlgmr.msra.gmra.mxu1 %v1185_v49 }
 0x127   : > { %v1008_v50 = vpop.f32.mrf.mxu0  ;;  %v1012_v12 = vpop.f32.mrf.mxu1 }
 0x128   : > { %v671_v63 = vadd.f32 %v1008_v50, %v892_v27  ;;  %v675_v26 = vadd.f32 %v1012_v12, %v892_v27 }
 0x129   : > { %v638_v51 = vpop.f32.mrf.mxu0  ;;  %v654_v34 = vpop.f32.mrf.mxu1 }
 0x12a   : > { %v669_v28 = vadd.f32 %v892_v27, %v638_v51  ;;  %v673_v52 = vadd.f32 %v892_v27, %v654_v34  ;;  %v698_v56 = vmax.f32 %v671_v63, 0.0  ;;  %v702_v38 = vmax.f32 %v675_v26, 0.0 }
 0x12b   : > { %v1009_v10 = vpop.f32.mrf.mxu0  ;;  %v1013_v53 = vpop.f32.mrf.mxu1 }
 0x12c   : > { %v672_v54 = vadd.f32 %v1009_v10, %v892_v27  ;;  %v676_v55 = vadd.f32 %v1013_v53, %v892_v27  ;;  %v696_v61 = vmax.f32 %v669_v28, 0.0  ;;  %v700_v62 = vmax.f32 %v673_v52, 0.0 }
 0x12d   : > { %v641_v35 = vpop.f32.mrf.mxu0  ;;  %v657_v57 = vpop.f32.mrf.mxu1 }
 0x12e   : > { %v699_v58 = vmax.f32 %v672_v54, 0.0  ;;  %v703_v13 = vmax.f32 %v676_v55, 0.0  ;;  %v670_v59 = vadd.f32 %v892_v27, %v641_v35  ;;  %v674_v60 = vadd.f32 %v892_v27, %v657_v57 }
 0x130   : > { %v956_v1 = vpack.c.bf16 %v699_v58, %v698_v56  ;;  %v966_v2 = vpack.c.bf16 %v703_v13, %v702_v38  ;;  %v697_v3 = vmax.f32 %v670_v59, 0.0  ;;  %v701_v4 = vmax.f32 %v674_v60, 0.0 }
 0x132   : > { %975 = vst [vmem:[%s367_s12 + $0x8] sm:$0xff] %v956_v1   ;;  %977 = vst [vmem:[%s367_s12 + $0x18] sm:$0xff] %v966_v2   ;;  %v951_v0 = vpack.c.bf16 %v697_v3, %v696_v61  ;;  %v961_v23 = vpack.c.bf16 %v701_v4, %v700_v62 }
 0x134   : > { %952 = vst [vmem:[%s367_s12] sm:$0xff] %v951_v0   ;;  %976 = vst [vmem:[%s367_s12 + $0x10] sm:$0xff] %v961_v23  }
 0x135 PF: > { %s17_s25 = sadd.s32 1, %s1210_s25   ;;  %s1618_s23 = smov %s1206_s24 }
 0x136   : > { %p14_p5 = scmp.ge.s32.totalorder %s17_s25, 4   ;;  %s1619_s24 = smov %s1621_s5 }
 0x138   :  { %16 = sbr.rel (!%p14_p5) target bundleno = 2 (0x2), region = 94 }

// kernel: quant_wrapper_forward.11
= control target key start
LH: loop header
LB: loop body
LE: loop exit
PB: predicated region body
PF: predicated region fallthrough
CT: control target
= control target key end

     0   :  { %v1162_v1 = vmov 0   ;;  %v1163_v57 = vmov -inf   ;;  %v1164_v58 = vmov 0.0   ;;  %s1705_s0 = inlined_call_operand.vmem [shape: bf16[128,128], index: 0, kind: input, shape index: {}]   ;;  %s1706_s2 = inlined_call_operand.vmem [shape: f32[256,1], index: 2, kind: input, shape index: {}]   ;;  %s1707_s1 = inlined_call_operand.vmem [shape: bf16[256,128], index: 1, kind: input, shape index: {}]   ;;  %s1708_s3 = inlined_call_operand.vmem [shape: s32[1,128], index: 3, kind: input, shape index: {}]   ;;  %s1709_s4 = inlined_call_operand.vmem [shape: f32[1,128], index: 4, kind: input, shape index: {}]   ;;  %s1710_s5 = inlined_call_operand.vmem [shape: f32[1,128], index: 5, kind: output, shape index: {}]  }
   0x1   :  { %v1070_v0 = vld [vmem:[%s1705_s0 + $0x38] sm:$0xff]   ;;  %1069 = vset.pattern.permute.xlu1 %v1162_v1  ;;  %1068 = vset.pattern.permute.xlu0 %v1162_v1  ;;  %v1071_v2 = vld [vmem:[%s1705_s0 + $0x30] sm:$0xff]   ;;  %v1072_v3 = vld [vmem:[%s1705_s0 + $0x28] sm:$0xff]   ;;  %25 = vst [vmem:[#allocation2] sm:$0x1] %v1163_v57 }
   0x2   :  { %1001 = vmatprep.subr.bf16.mxu0 %v1070_v0  ;;  %1049 = vmatprep.subr.bf16.mxu1 %v1070_v0  ;;  %v78_v4 = vld [vmem:[%s1706_s2 + $0x10] sm:$0xff]  ;;  %v76_v5 = vld [vmem:[%s1706_s2] sm:$0xff]  ;;  %v79_v6 = vld [vmem:[%s1706_s2 + $0x18] sm:$0xff]  ;;  %26 = vst [vmem:[#allocation3] sm:$0x1] %v1164_v58 }
   0x3   :  { %1002 = vmatpush3.bf16.msra.mxu0 %v1070_v0  ;;  %1057 = vmatpush3.bf16.msra.mxu1 %v1070_v0  ;;  %v77_v7 = vld [vmem:[%s1706_s2 + $0x8] sm:$0xff]  ;;  %v1073_v8 = vld [vmem:[%s1705_s0 + $0x20] sm:$0xff]   ;;  %v1074_v12 = vld [vmem:[%s1705_s0 + $0x18] sm:$0xff]   ;;  %27 = vst [vmem:[#allocation4] sm:$0x1] %v1164_v58 }
   0x4   :  { %1003 = vmatprep.subr.bf16.mxu0 %v1071_v2  ;;  %1050 = vmatprep.subr.bf16.mxu1 %v1071_v2  ;;  %v81_v9 = vld [vmem:[%s1706_s2 + $0x28] sm:$0xff]  ;;  %v80_v10 = vld [vmem:[%s1706_s2 + $0x20] sm:$0xff]  ;;  %v83_v14 = vld [vmem:[%s1706_s2 + $0x38] sm:$0xff] }
   0x5   :  { %120 = vperm.xlu1 %1069, %v78_v4   ;;  %110 = vperm.xlu0 %1068, %v76_v5   ;;  %v1078_v11 = vld [vmem:[%s1707_s1] sm:$0xff]   ;;  %v82_v15 = vld [vmem:[%s1706_s2 + $0x30] sm:$0xff]  ;;  %v85_v17 = vld [vmem:[%s1706_s2 + $0x48] sm:$0xff] }
   0x6   :  { %1017 = vmatprep.mubr.bf16.mxu0 %v1078_v11  ;;  %v1079_v13 = vld [vmem:[%s1707_s1 + $0x40] sm:$0xff]   ;;  %v1075_v16 = vld [vmem:[%s1705_s0 + $0x10] sm:$0xff]   ;;  %v1076_v19 = vld [vmem:[%s1705_s0 + $0x8] sm:$0xff]  }
   0x7   :  { %1004 = vmatpush3.bf16.msra.mxu0 %v1071_v2  ;;  %1058 = vmatpush3.bf16.msra.mxu1 %v1071_v2  ;;  %v84_v18 = vld [vmem:[%s1706_s2 + $0x40] sm:$0xff]  ;;  %v87_v20 = vld [vmem:[%s1706_s2 + $0x58] sm:$0xff]  ;;  %v86_v21 = vld [vmem:[%s1706_s2 + $0x50] sm:$0xff] }
   0x8   :  { %1005 = vmatprep.subr.bf16.mxu0 %v1072_v3  ;;  %1051 = vmatprep.subr.bf16.mxu1 %v1072_v3  ;;  %v1077_v22 = vld [vmem:[%s1705_s0] sm:$0xff]   ;;  %v89_v23 = vld [vmem:[%s1706_s2 + $0x68] sm:$0xff]  ;;  %v1082_v27 = vld [vmem:[%s1707_s1 + $0x10] sm:$0xff]  }
   0x9   :  { %125 = vperm.xlu1 %1069, %v79_v6   ;;  %115 = vperm.xlu0 %1068, %v77_v7   ;;  %v88_v24 = vld [vmem:[%s1706_s2 + $0x60] sm:$0xff]  ;;  %v1080_v25 = vld [vmem:[%s1707_s1 + $0x8] sm:$0xff]   ;;  %v1083_v28 = vld [vmem:[%s1707_s1 + $0x50] sm:$0xff]  }
   0xa   :  { %1033 = vmatprep.mubr.bf16.mxu1 %v1079_v13  ;;  %v1081_v26 = vld [vmem:[%s1707_s1 + $0x48] sm:$0xff]   ;;  %v91_v29 = vld [vmem:[%s1706_s2 + $0x78] sm:$0xff]  ;;  %v90_v30 = vld [vmem:[%s1706_s2 + $0x70] sm:$0xff] }
   0xb   :  { %1006 = vmatpush3.bf16.msra.mxu0 %v1072_v3  ;;  %1059 = vmatpush3.bf16.msra.mxu1 %v1072_v3  ;;  %v93_v31 = vld [vmem:[%s1706_s2 + $0x88] sm:$0xff]  ;;  %v92_v32 = vld [vmem:[%s1706_s2 + $0x80] sm:$0xff]  ;;  %v1084_v33 = vld [vmem:[%s1707_s1 + $0x18] sm:$0xff]  }
   0xc   :  { %1007 = vmatprep.subr.bf16.mxu0 %v1073_v8  ;;  %1052 = vmatprep.subr.bf16.mxu1 %v1073_v8  ;;  %v1085_v34 = vld [vmem:[%s1707_s1 + $0x58] sm:$0xff]   ;;  %v1086_v35 = vld [vmem:[%s1707_s1 + $0x20] sm:$0xff]   ;;  %v94_v38 = vld [vmem:[%s1706_s2 + $0x90] sm:$0xff] }
   0xd   :  { %135 = vperm.xlu1 %1069, %v81_v9   ;;  %130 = vperm.xlu0 %1068, %v80_v10   ;;  %v1087_v36 = vld [vmem:[%s1707_s1 + $0x60] sm:$0xff]   ;;  %v95_v37 = vld [vmem:[%s1706_s2 + $0x98] sm:$0xff]  ;;  %v97_v39 = vld [vmem:[%s1706_s2 + $0xa8] sm:$0xff] }
   0xe   :  { %v96_v40 = vld [vmem:[%s1706_s2 + $0xa0] sm:$0xff]  ;;  %v1088_v41 = vld [vmem:[%s1707_s1 + $0x28] sm:$0xff]   ;;  %v1090_v43 = vld [vmem:[%s1707_s1 + $0x30] sm:$0xff]  }
   0xf   :  { %1008 = vmatpush3.bf16.msra.mxu0 %v1073_v8  ;;  %1060 = vmatpush3.bf16.msra.mxu1 %v1073_v8  ;;  %v1089_v42 = vld [vmem:[%s1707_s1 + $0x68] sm:$0xff]   ;;  %v1091_v44 = vld [vmem:[%s1707_s1 + $0x70] sm:$0xff]   ;;  %v99_v45 = vld [vmem:[%s1706_s2 + $0xb8] sm:$0xff] }
  0x10   :  { %1009 = vmatprep.subr.bf16.mxu0 %v1074_v12  ;;  %1053 = vmatprep.subr.bf16.mxu1 %v1074_v12  ;;  %v98_v46 = vld [vmem:[%s1706_s2 + $0xb0] sm:$0xff]  ;;  %v101_v47 = vld [vmem:[%s1706_s2 + $0xc8] sm:$0xff]  ;;  %v100_v48 = vld [vmem:[%s1706_s2 + $0xc0] sm:$0xff] }
  0x11   :  { %145 = vperm.xlu1 %1069, %v83_v14   ;;  %140 = vperm.xlu0 %1068, %v82_v15   ;;  %v1092_v49 = vld [vmem:[%s1707_s1 + $0x38] sm:$0xff]   ;;  %v102_v52 = vld [vmem:[%s1706_s2 + $0xd0] sm:$0xff]  ;;  %v105_v53 = vld [vmem:[%s1706_s2 + $0xe8] sm:$0xff]  ;;  %v618_v15 = vlaneseq }
  0x12   :  { %v1093_v50 = vld [vmem:[%s1707_s1 + $0x78] sm:$0xff]   ;;  %v104_v54 = vld [vmem:[%s1706_s2 + $0xe0] sm:$0xff]  ;;  %v106_v56 = vld [vmem:[%s1706_s2 + $0xf0] sm:$0xff] }
  0x13   :  { %1010 = vmatpush3.bf16.msra.mxu0 %v1074_v12  ;;  %1061 = vmatpush3.bf16.msra.mxu1 %v1074_v12  ;;  %v103_v51 = vld [vmem:[%s1706_s2 + $0xd8] sm:$0xff] }
  0x14   :  { %1011 = vmatprep.subr.bf16.mxu0 %v1075_v16  ;;  %1054 = vmatprep.subr.bf16.mxu1 %v1075_v16  ;;  %v107_v55 = vld [vmem:[%s1706_s2 + $0xf8] sm:$0xff] }
  0x15   :  { %155 = vperm.xlu1 %1069, %v85_v17   ;;  %150 = vperm.xlu0 %1068, %v84_v18   ;;  %v1387_v18 = vshrl.u32 %v618_v15, 7 }
  0x17   :  { %1012 = vmatpush3.bf16.msra.mxu0 %v1075_v16  ;;  %1062 = vmatpush3.bf16.msra.mxu1 %v1075_v16  ;;  %v767_v15 = vadd.s32 56, %v1387_v18 }
  0x18   :  { %1013 = vmatprep.subr.bf16.mxu0 %v1076_v19  ;;  %1055 = vmatprep.subr.bf16.mxu1 %v1076_v19 }
  0x19   :  { %165 = vperm.xlu1 %1069, %v87_v20   ;;  %160 = vperm.xlu0 %1068, %v86_v21  }
  0x1b   :  { %1014 = vmatpush3.bf16.msra.mxu0 %v1076_v19  ;;  %1063 = vmatpush3.bf16.msra.mxu1 %v1076_v19 }
  0x1c   :  { %1015 = vmatprep.subr.bf16.mxu0 %v1077_v22  ;;  %1056 = vmatprep.subr.bf16.mxu1 %v1077_v22 }
  0x1d   :  { %175 = vperm.xlu1 %1069, %v89_v23   ;;  %170 = vperm.xlu0 %1068, %v88_v24   ;;  %v761_v23 = vadd.s32 8, %v1387_v18 }
  0x1f   :  { %1016 = vmatpush3.bf16.msra.mxu0 %v1077_v22  ;;  %1064 = vmatpush3.bf16.msra.mxu1 %v1077_v22 }
  0x21   :  { %185 = vperm.xlu1 %1069, %v91_v29   ;;  %180 = vperm.xlu0 %1068, %v90_v30   ;;  %v1400_v30 = vld [vmem:[%s1708_s3] ss:$0 sm:$0xff] }
  0x22   :  { %1018 = vmatmul.mubr.bf16.vlgmr.msra.gmra.mxu0 %v1080_v25  ;;  %1034 = vmatmul.mubr.bf16.vlgmr.msra.gmra.mxu1 %v1081_v26  ;;  %vm832_vm0 = vcmp.eq.s32.totalorder %v1387_v18, %v1400_v30  ;;  %vm833_vm1 = vcmp.eq.s32.totalorder %v761_v23, %v1400_v30  ;;  %vm839_vm7 = vcmp.eq.s32.totalorder %v767_v15, %v1400_v30 }
  0x23   :  { %1021 = vmatprep.mubr.bf16.mxu0 %v1082_v27  ;;  %1037 = vmatprep.mubr.bf16.mxu1 %v1083_v28  ;;  %v762_v27 = vadd.s32 16, %v1387_v18 }
  0x25   :  { %195 = vperm.xlu1 %1069, %v93_v31   ;;  %190 = vperm.xlu0 %1068, %v92_v32   ;;  %vm834_vm2 = vcmp.eq.s32.totalorder %v762_v27, %v1400_v30 }
  0x29   :  { %205 = vperm.xlu1 %1069, %v95_v37   ;;  %200 = vperm.xlu0 %1068, %v94_v38  }
  0x2a   :  { %1022 = vmatmul.mubr.bf16.gmra.mxu0 %v1084_v33  ;;  %1038 = vmatmul.mubr.bf16.gmra.mxu1 %v1085_v34  ;;  %v763_v33 = vadd.s32 24, %v1387_v18 }
  0x2b   :  { %1025 = vmatprep.mubr.bf16.mxu0 %v1086_v35  ;;  %1041 = vmatprep.mubr.bf16.mxu1 %v1087_v36 }
  0x2c   :  { %vm835_vm3 = vcmp.eq.s32.totalorder %v763_v33, %v1400_v30 }
  0x2d   :  { %215 = vperm.xlu1 %1069, %v97_v39   ;;  %210 = vperm.xlu0 %1068, %v96_v40  }
  0x31   :  { %225 = vperm.xlu1 %1069, %v99_v45   ;;  %220 = vperm.xlu0 %1068, %v98_v46  }
  0x32   :  { %1026 = vmatmul.mubr.bf16.gmra.mxu0 %v1088_v41  ;;  %1042 = vmatmul.mubr.bf16.gmra.mxu1 %v1089_v42 }
  0x33   :  { %1029 = vmatprep.mubr.bf16.mxu0 %v1090_v43  ;;  %1045 = vmatprep.mubr.bf16.mxu1 %v1091_v44  ;;  %v764_v44 = vadd.s32 32, %v1387_v18 }
  0x35   :  { %235 = vperm.xlu1 %1069, %v101_v47   ;;  %230 = vperm.xlu0 %1068, %v100_v48   ;;  %vm836_vm4 = vcmp.eq.s32.totalorder %v764_v44, %v1400_v30 }
  0x39   :  { %245 = vperm.xlu1 %1069, %v103_v51   ;;  %240 = vperm.xlu0 %1068, %v102_v52  }
  0x3a   :  { %1030 = vmatmul.mubr.bf16.gmra.mxu0 %v1092_v49  ;;  %1046 = vmatmul.mubr.bf16.gmra.mxu1 %v1093_v50 }
  0x3d   :  { %255 = vperm.xlu1 %1069, %v105_v53   ;;  %250 = vperm.xlu0 %1068, %v104_v54   ;;  %v765_v54 = vadd.s32 40, %v1387_v18 }
  0x3f   :  { %vm837_vm5 = vcmp.eq.s32.totalorder %v765_v54, %v1400_v30 }
  0x41   :  { %265 = vperm.xlu1 %1069, %v107_v55   ;;  %260 = vperm.xlu0 %1068, %v106_v56   ;;  %v766_v56 = vadd.s32 48, %v1387_v18 }
  0x43   :  { %vm838_vm6 = vcmp.eq.s32.totalorder %v766_v56, %v1400_v30 }
  0x80   :  { %v111_v59 = vpop.permute.xlu0 %110  ;;  %v121_v60 = vpop.permute.xlu1 %120 }
  0x84   :  { %v116_v61 = vpop.permute.xlu0 %115  ;;  %v126_v62 = vpop.permute.xlu1 %125 }
  0x88   :  { %v1363_v63 = vpop.permute.xlu0 %130  ;;  %v1365_v0 = vpop.permute.xlu1 %135 }
  0x8c   :  { %v1367_v1 = vpop.permute.xlu0 %140  ;;  %v1369_v2 = vpop.permute.xlu1 %145 }
  0x90   :  { %v1371_v3 = vpop.permute.xlu0 %150  ;;  %v1373_v4 = vpop.permute.xlu1 %155 }
  0x94   :  { %v1375_v5 = vpop.permute.xlu0 %160  ;;  %v1377_v6 = vpop.permute.xlu1 %165 }
  0x98   :  { %v1379_v7 = vpop.permute.xlu0 %170  ;;  %v1381_v8 = vpop.permute.xlu1 %175 }
  0x9c   :  { %v1383_v9 = vpop.permute.xlu0 %180  ;;  %v1385_v10 = vpop.permute.xlu1 %185 }
  0xa0   :  { %v191_v11 = vpop.permute.xlu0 %190  ;;  %v196_v12 = vpop.permute.xlu1 %195 }
  0xa4   :  { %v201_v13 = vpop.permute.xlu0 %200  ;;  %v206_v14 = vpop.permute.xlu1 %205 }
  0xa8   :  { %v211_v16 = vpop.permute.xlu0 %210  ;;  %v1389_v20 = vpop.permute.xlu1 %215 }
  0xac   :  { %v221_v24 = vpop.permute.xlu0 %220  ;;  %v226_v37 = vpop.permute.xlu1 %225 }
  0xb0   :  { %v231_v45 = vpop.permute.xlu0 %230 }
  0xe2   :  { %v1019_v17 = vpop.f32.mrf.mxu0  ;;  %v1035_v19 = vpop.f32.mrf.mxu1 }
  0xe3   :  { %v1392_v25 = vadd.f32 %v1035_v19, %v201_v13  ;;  %v1412_v38 = vadd.f32 %v1019_v17, %v121_v60 }
  0xe4   :  { %v446_v21 = vpop.f32.mrf.mxu0  ;;  %v510_v22 = vpop.f32.mrf.mxu1 }
  0xe5   :  { %v1394_v26 = vadd.f32 %v510_v22, %v191_v11  ;;  %v1402_v31 = vadd.f32 %v446_v21, %v111_v59  ;;  %v866_v55 = vsel %vm834_vm2, %v1412_v38, 0.0  ;;  %v236_v11 = vpop.permute.xlu1 %235 }
  0xe6   :  { %v1020_v28 = vpop.f32.mrf.mxu0  ;;  %v1036_v29 = vpop.f32.mrf.mxu1 }
  0xe7   :  { %v588_v32 = vmax.f32 %v1394_v26, %v1392_v25  ;;  %v1409_v34 = vadd.f32 %v1036_v29, %v206_v14  ;;  %v864_v46 = vsel %vm832_vm0, %v1402_v31, 0.0  ;;  %v1425_v47 = vadd.f32 %v1020_v28, %v126_v62 }
  0xe8   :  { %v449_v35 = vpop.f32.mrf.mxu0  ;;  %v513_v36 = vpop.f32.mrf.mxu1 }
  0xe9   :  { %v1414_v39 = vadd.f32 %v449_v35, %v116_v61  ;;  %v1416_v40 = vadd.f32 %v513_v36, %v196_v12  ;;  %v592_v41 = vmax.f32 %v588_v32, %v1409_v34  ;;  %v867_v12 = vsel %vm835_vm3, %v1425_v47, 0.0 }
  0xea   :  { %v1023_v42 = vpop.f32.mrf.mxu0  ;;  %v1039_v43 = vpop.f32.mrf.mxu1 }
  0xeb   :  { %v865_v48 = vsel %vm833_vm1, %v1414_v39, 0.0  ;;  %v1428_v49 = vadd.f32 %v1039_v43, %v221_v24  ;;  %v596_v51 = vmax.f32 %v592_v41, %v1416_v40  ;;  %v1453_v21 = vadd.f32 %v1023_v42, %v1367_v1  ;;  %v246_v43 = vpop.permute.xlu1 %245 }
  0xec   :  { %v896_v50 = vadd.f32 %v865_v48, %v864_v46  ;;  %v462_v52 = vpop.f32.mrf.mxu0  ;;  %v526_v53 = vpop.f32.mrf.mxu1  ;;  %v768_v1 = vadd.s32 64, %v1387_v18 }
  0xed   :  { %v1438_v57 = vadd.f32 %v462_v52, %v1363_v63  ;;  %v600_v59 = vmax.f32 %v596_v51, %v1428_v49  ;;  %v1442_v60 = vadd.f32 %v526_v53, %v211_v16  ;;  %v241_v16 = vpop.permute.xlu0 %240  ;;  %v870_v44 = vsel %vm838_vm6, %v1453_v21, 0.0 }
  0xee   :  { %v897_v58 = vadd.f32 %v896_v50, %v866_v55  ;;  %v1024_v61 = vpop.f32.mrf.mxu0  ;;  %v1040_v62 = vpop.f32.mrf.mxu1  ;;  %vm840_vm8 = vcmp.eq.s32.totalorder %v768_v1, %v1400_v30 }
  0xef   :  { %v1447_v13 = vadd.f32 %v1040_v62, %v226_v37  ;;  %v586_v63 = vmax.f32 %v1442_v60, %v600_v59  ;;  %v868_v22 = vsel %vm836_vm4, %v1438_v57, 0.0  ;;  %v1468_v33 = vadd.f32 %v1024_v61, %v1369_v2 }
  0xf0   :  { %v898_v14 = vadd.f32 %v897_v58, %v867_v12  ;;  %v465_v17 = vpop.f32.mrf.mxu0  ;;  %v529_v19 = vpop.f32.mrf.mxu1  ;;  %v770_v2 = vadd.s32 80, %v1387_v18  ;;  %v771_v61 = vadd.s32 88, %v1387_v18  ;;  %v576_v12 = vmax.f32 %v1412_v38, %v1453_v21 }
  0xf1   :  { %v1460_v23 = vadd.f32 %v465_v17, %v1365_v0  ;;  %v590_v27 = vmax.f32 %v586_v63, %v1447_v13  ;;  %v1464_v28 = vadd.f32 %v529_v19, %v1389_v20  ;;  %v769_v20 = vadd.s32 72, %v1387_v18  ;;  %v251_v54 = vpop.permute.xlu0 %250 }
  0xf2   :  { %v899_v24 = vadd.f32 %v898_v14, %v868_v22  ;;  %v1027_v29 = vpop.f32.mrf.mxu0  ;;  %v1043_v32 = vpop.f32.mrf.mxu1  ;;  %v871_v55 = vsel %vm839_vm7, %v1468_v33, 0.0  ;;  %vm842_vm10 = vcmp.eq.s32.totalorder %v770_v2, %v1400_v30  ;;  %vm843_vm11 = vcmp.eq.s32.totalorder %v771_v61, %v1400_v30 }
  0xf3   :  { %v869_v35 = vsel %vm837_vm5, %v1460_v23, 0.0  ;;  %v1471_v36 = vadd.f32 %v1043_v32, %v241_v16  ;;  %v594_v37 = vmax.f32 %v590_v27, %v1464_v28  ;;  %v1491_v56 = vadd.f32 %v1027_v29, %v1375_v5 }
  0xf4   :  { %v900_v0 = vadd.f32 %v899_v24, %v869_v35  ;;  %v478_v41 = vpop.f32.mrf.mxu0  ;;  %v542_v42 = vpop.f32.mrf.mxu1  ;;  %vm841_vm9 = vcmp.eq.s32.totalorder %v769_v20, %v1400_v30  ;;  %v772_v16 = vadd.s32 96, %v1387_v18  ;;  %v773_v35 = vadd.s32 104, %v1387_v18 }
  0xf5   :  { %v1481_v46 = vadd.f32 %v478_v41, %v1371_v3  ;;  %v598_v50 = vmax.f32 %v594_v37, %v1471_v36  ;;  %v1485_v51 = vadd.f32 %v542_v42, %v231_v45  ;;  %v580_v22 = vmax.f32 %v576_v12, %v1491_v56  ;;  %v261_v41 = vpop.permute.xlu0 %260 }
  0xf6   :  { %v901_v48 = vadd.f32 %v900_v0, %v870_v44  ;;  %v1028_v52 = vpop.f32.mrf.mxu0  ;;  %v1044_v53 = vpop.f32.mrf.mxu1  ;;  %vm844_vm12 = vcmp.eq.s32.totalorder %v772_v16, %v1400_v30  ;;  %vm845_vm13 = vcmp.eq.s32.totalorder %v773_v35, %v1400_v30 }
  0xf7   :  { %v1493_v58 = vadd.f32 %v1044_v53, %v246_v43  ;;  %v589_v59 = vmax.f32 %v1485_v51, %v598_v50  ;;  %v872_v5 = vsel %vm840_vm8, %v1481_v46, 0.0  ;;  %v1513_v24 = vadd.f32 %v1028_v52, %v1377_v6 }
  0xf8   :  { %v902_v3 = vadd.f32 %v901_v48, %v871_v55  ;;  %v481_v62 = vpop.f32.mrf.mxu0  ;;  %v545_v45 = vpop.f32.mrf.mxu1  ;;  %v874_v6 = vsel %vm842_vm10, %v1491_v56, 0.0  ;;  %v774_v43 = vadd.s32 112, %v1387_v18  ;;  %v577_v53 = vmax.f32 %v1425_v47, %v1468_v33 }
  0xf9   :  { %v1505_v14 = vadd.f32 %v481_v62, %v1373_v4  ;;  %v593_v15 = vmax.f32 %v589_v59, %v1493_v58  ;;  %v1508_v17 = vadd.f32 %v545_v45, %v236_v11  ;;  %v574_v4 = vmax.f32 %v1402_v31, %v1438_v57  ;;  %v256_v48 = vpop.permute.xlu1 %255 }
  0xfa   :  { %v903_v63 = vadd.f32 %v902_v3, %v872_v5  ;;  %v1031_v19 = vpop.f32.mrf.mxu0  ;;  %v1047_v32 = vpop.f32.mrf.mxu1  ;;  %v875_v2 = vsel %vm843_vm11, %v1513_v24, 0.0  ;;  %vm846_vm14 = vcmp.eq.s32.totalorder %v774_v43, %v1400_v30  ;;  %v779_v43 = vadd.s32 152, %v1387_v18 }
  0xfb   :  { %v873_v27 = vsel %vm841_vm9, %v1505_v14, 0.0  ;;  %v1517_v29 = vadd.f32 %v1031_v19, %v1383_v9  ;;  %v597_v0 = vmax.f32 %v593_v15, %v1508_v17  ;;  %v578_v42 = vmax.f32 %v574_v4, %v1481_v46 }
  0xfc   :  { %v904_v11 = vadd.f32 %v903_v63, %v873_v27  ;;  %v494_v1 = vpop.f32.mrf.mxu0  ;;  %v1537_v52 = vadd.f32 %v1047_v32, %v261_v41  ;;  %v558_v59 = vpop.f32.mrf.mxu1  ;;  %v776_v63 = vadd.s32 128, %v1387_v18  ;;  %v581_v19 = vmax.f32 %v577_v53, %v1513_v24 }
  0xfd   :  { %v584_v37 = vmax.f32 %v580_v22, %v1517_v29  ;;  %v1529_v9 = vadd.f32 %v494_v1, %v1379_v7  ;;  %v775_v7 = vadd.s32 120, %v1387_v18  ;;  %v1555_v22 = vadd.f32 %v558_v59, %v251_v54 }
  0xfe   :  { %v905_v20 = vadd.f32 %v904_v11, %v874_v6  ;;  %v1032_v44 = vpop.f32.mrf.mxu0  ;;  %v777_v4 = vadd.s32 136, %v1387_v18  ;;  %v878_v32 = vsel %vm846_vm14, %v1517_v29, 0.0  ;;  %v266_v6 = vpop.permute.xlu1 %265  ;;  %v778_v54 = vadd.s32 144, %v1387_v18 }
  0xff   :  { %v601_v50 = vmax.f32 %v597_v0, %v584_v37  ;;  %v582_v55 = vmax.f32 %v578_v42, %v1529_v9  ;;  %v876_v61 = vsel %vm844_vm12, %v1529_v9, 0.0  ;;  %v1547_v12 = vadd.f32 %v1032_v44, %v1385_v10  ;;  %v1048_v10 = vpop.f32.mrf.mxu1 }
 0x100   :  { %v906_v3 = vadd.f32 %v905_v20, %v875_v2  ;;  %v497_v62 = vpop.f32.mrf.mxu0  ;;  %vm847_vm15 = vcmp.eq.s32.totalorder %v775_v7, %v1400_v30  ;;  %vm848_vm0 = vcmp.eq.s32.totalorder %v776_v63, %v1400_v30  ;;  %v1569_v20 = vadd.f32 %v1048_v10, %v266_v6 }
 0x101   :  { %v603_v45 = vmax.f32 %v1537_v52, %v601_v50  ;;  %v1550_v5 = vadd.f32 %v497_v62, %v1381_v8  ;;  %v575_v8 = vmax.f32 %v1414_v39, %v1460_v23  ;;  %v585_v35 = vmax.f32 %v581_v19, %v1547_v12  ;;  %v561_v2 = vpop.f32.mrf.mxu1 }
 0x102   :  { %v907_v15 = vadd.f32 %v906_v3, %v876_v61  ;;  %v879_v42 = vsel %vm847_vm15, %v1547_v12, 0.0  ;;  %vm849_vm1 = vcmp.eq.s32.totalorder %v777_v4, %v1400_v30  ;;  %v880_v50 = vsel %vm848_vm0, %v1394_v26, 0.0 }
 0x103   :  { %v587_v16 = vmax.f32 %v582_v55, %v603_v45  ;;  %v877_v27 = vsel %vm845_vm13, %v1550_v5, 0.0  ;;  %v579_v37 = vmax.f32 %v575_v8, %v1505_v14  ;;  %vm850_vm2 = vcmp.eq.s32.totalorder %v778_v54, %v1400_v30 }
 0x104   :  { %v908_v11 = vadd.f32 %v907_v15, %v877_v27  ;;  %v780_v55 = vadd.s32 160, %v1387_v18  ;;  %v881_v59 = vsel %vm849_vm1, %v1416_v40, 0.0  ;;  %v1579_v45 = vadd.f32 %v561_v2, %v256_v48 }
 0x105   :  { %v591_v1 = vmax.f32 %v587_v16, %v1555_v22  ;;  %v583_v53 = vmax.f32 %v579_v37, %v1550_v5  ;;  %vm851_vm3 = vcmp.eq.s32.totalorder %v779_v43, %v1400_v30  ;;  %v882_v63 = vsel %vm850_vm2, %v1392_v25, 0.0 }
 0x106   :  { %v909_v0 = vadd.f32 %v908_v11, %v878_v32  ;;  %vm852_vm4 = vcmp.eq.s32.totalorder %v780_v55, %v1400_v30  ;;  %v781_v19 = vadd.s32 168, %v1387_v18  ;;  %v883_v27 = vsel %vm851_vm3, %v1409_v34, 0.0 }
 0x107   :  { %v595_v41 = vmax.f32 %v591_v1, %v585_v35  ;;  %v884_v11 = vsel %vm852_vm4, %v1442_v60, 0.0  ;;  %v782_v8 = vadd.s32 176, %v1387_v18  ;;  %v783_v54 = vadd.s32 184, %v1387_v18 }
 0x108   :  { %v910_v44 = vadd.f32 %v909_v0, %v879_v42  ;;  %vm853_vm5 = vcmp.eq.s32.totalorder %v781_v19, %v1400_v30 }
 0x109   :  { %v599_v7 = vmax.f32 %v595_v41, %v1569_v20  ;;  %v885_v35 = vsel %vm853_vm5, %v1464_v28, 0.0  ;;  %vm854_vm6 = vcmp.eq.s32.totalorder %v782_v8, %v1400_v30  ;;  %v1593_v41 = vld [vmem:[#allocation2] sm:$0x1]  ;;  %vm855_vm7 = vcmp.eq.s32.totalorder %v783_v54, %v1400_v30 }
 0x10a   :  { %v911_v3 = vadd.f32 %v910_v44, %v880_v50  ;;  %v886_v42 = vsel %vm854_vm6, %v1428_v49, 0.0  ;;  %v784_v44 = vadd.s32 192, %v1387_v18 }
 0x10b   :  { %v602_v62 = vmax.f32 %v583_v53, %v599_v7  ;;  %v620_v7 = vsub.s32 0, %v1387_v18  ;;  %v887_v53 = vsel %vm855_vm7, %v1447_v13, 0.0 }
 0x10c   :  { %v912_v61 = vadd.f32 %v911_v3, %v881_v59  ;;  %vm856_vm8 = vcmp.eq.s32.totalorder %v784_v44, %v1400_v30  ;;  %v785_v3 = vadd.s32 200, %v1387_v18 }
 0x10d   :  { %v604_v15 = vmax.f32 %v602_v62, %v1579_v45 }
 0x10e   :  { %v913_v16 = vadd.f32 %v912_v61, %v882_v63  ;;  %v888_v61 = vsel %vm856_vm8, %v1485_v51, 0.0  ;;  %v786_v63 = vadd.s32 208, %v1387_v18  ;;  %vm857_vm9 = vcmp.eq.s32.totalorder %v785_v3, %v1400_v30 }
 0x10f   :  { %v605_v4 = vrot.slane %v604_v15, 4 }
 0x110   :  { %v914_v10 = vadd.f32 %v913_v16, %v883_v27  ;;  %vm858_vm10 = vcmp.eq.s32.totalorder %v786_v63, %v1400_v30 }
 0x111   :  { %v606_v48 = vmax.f32 %v604_v15, %v605_v4  ;;  %v787_v4 = vadd.s32 216, %v1387_v18 }
 0x112   :  { %v915_v32 = vadd.f32 %v914_v10, %v884_v11  ;;  %v889_v10 = vsel %vm857_vm9, %v1508_v17, 0.0 }
 0x113   :  { %v607_v1 = vrot.slane %v606_v48, 2  ;;  %vm859_vm11 = vcmp.eq.s32.totalorder %v787_v4, %v1400_v30 }
 0x114   :  { %v916_v0 = vadd.f32 %v915_v32, %v885_v35 }
 0x115   :  { %v608_v6 = vmax.f32 %v606_v48, %v607_v1 }
 0x116   :  { %v917_v2 = vadd.f32 %v916_v0, %v886_v42  ;;  %v790_v42 = vadd.s32 240, %v1387_v18 }
 0x117   :  { %v609_v37 = vrot.slane %v608_v6, 1 }
 0x118   :  { %v918_v59 = vadd.f32 %v917_v2, %v887_v53  ;;  %v791_v2 = vadd.s32 248, %v1387_v18  ;;  %vm862_vm14 = vcmp.eq.s32.totalorder %v790_v42, %v1400_v30 }
 0x119   :  { %v610_v43 = vmax.f32 %v608_v6, %v609_v37  ;;  %v891_v37 = vsel %vm859_vm11, %v1493_v58, 0.0 }
 0x11a   :  { %v919_v15 = vadd.f32 %v918_v59, %v888_v61  ;;  %vm863_vm15 = vcmp.eq.s32.totalorder %v791_v2, %v1400_v30 }
 0x11b   :  { %v1599_v50 = vmax.f32 %v1593_v41, %v610_v43 }
 0x11c   :  { %v920_v48 = vadd.f32 %v919_v15, %v889_v10  ;;  %v894_v15 = vsel %vm862_vm14, %v1537_v52, 0.0 }
 0x11d   :  { %v612_v55 = vsub.f32 %v1593_v41, %v1599_v50  ;;  %758 = vst [vmem:[#allocation2] sm:$0x1] %v1599_v50  ;;  %v1609_v62 = vrot.slane %v1599_v50, %v620_v7 }
 0x11f   :  { %v623_v19 = vsub.f32 %v1402_v31, %v1609_v62  ;;  %v624_v16 = vsub.f32 %v1414_v39, %v1609_v62  ;;  %v625_v27 = vsub.f32 %v1412_v38, %v1609_v62  ;;  %v626_v11 = vsub.f32 %v1425_v47, %v1609_v62 }
 0x120   :  { %v627_v31 = vsub.f32 %v1438_v57, %v1609_v62  ;;  %v890_v39 = vsel %vm858_vm10, %v1471_v36, 0.0  ;;  %v788_v38 = vadd.s32 224, %v1387_v18  ;;  %v628_v35 = vsub.f32 %v1460_v23, %v1609_v62 }
 0x121   :  { %v655_v8 = vmul.f32 1.442695, %v623_v19  ;;  %v657_v32 = vmul.f32 1.442695, %v624_v16  ;;  %v659_v1 = vmul.f32 1.442695, %v625_v27  ;;  %v921_v47 = vadd.f32 %v920_v48, %v890_v39 }
 0x122   :  { %v661_v6 = vmul.f32 1.442695, %v626_v11  ;;  %v629_v54 = vsub.f32 %v1453_v21, %v1609_v62  ;;  %v663_v0 = vmul.f32 1.442695, %v627_v31  ;;  %v789_v57 = vadd.s32 232, %v1387_v18 }
 0x123   :  { %1094 = vpow2.f32 %v655_v8  ;;  %vm860_vm12 = vcmp.eq.s32.totalorder %v788_v38, %v1400_v30  ;;  %v630_v43 = vsub.f32 %v1468_v33, %v1609_v62  ;;  %v665_v23 = vmul.f32 1.442695, %v628_v35 }
 0x124   :  { %1096 = vpow2.f32 %v657_v32  ;;  %v922_v44 = vadd.f32 %v921_v47, %v891_v37  ;;  %v631_v21 = vsub.f32 %v1481_v46, %v1609_v62  ;;  %v667_v7 = vmul.f32 1.442695, %v629_v54 }
 0x125   :  { %1098 = vpow2.f32 %v659_v1  ;;  %vm861_vm13 = vcmp.eq.s32.totalorder %v789_v57, %v1400_v30  ;;  %v892_v53 = vsel %vm860_vm12, %v1555_v22, 0.0  ;;  %v632_v3 = vsub.f32 %v1505_v14, %v1609_v62 }
 0x126   :  { %1100 = vpow2.f32 %v661_v6  ;;  %v669_v33 = vmul.f32 1.442695, %v630_v43  ;;  %v923_v59 = vadd.f32 %v922_v44, %v892_v53  ;;  %v893_v18 = vsel %vm861_vm13, %v1579_v45, 0.0 }
 0x127   :  { %1102 = vpow2.f32 %v663_v0  ;;  %v633_v46 = vsub.f32 %v1491_v56, %v1609_v62  ;;  %v671_v61 = vmul.f32 1.442695, %v631_v21  ;;  %v634_v16 = vsub.f32 %v1513_v24, %v1609_v62 }
 0x128   :  { %1104 = vpow2.f32 %v665_v23  ;;  %v924_v63 = vadd.f32 %v923_v59, %v893_v18  ;;  %v673_v14 = vmul.f32 1.442695, %v632_v3  ;;  %v895_v30 = vsel %vm863_vm15, %v1569_v20, 0.0 }
 0x129   :  { %1106 = vpow2.f32 %v667_v7  ;;  %v635_v10 = vsub.f32 %v1529_v9, %v1609_v62  ;;  %v675_v56 = vmul.f32 1.442695, %v633_v46  ;;  %v636_v32 = vsub.f32 %v1550_v5, %v1609_v62 }
 0x12a   :  { %1108 = vpow2.f32 %v669_v33  ;;  %v925_v27 = vadd.f32 %v924_v63, %v894_v15  ;;  %v677_v31 = vmul.f32 1.442695, %v634_v16  ;;  %v637_v38 = vsub.f32 %v1517_v29, %v1609_v62  ;;  %v826_v33 = vld [vmem:[#allocation4] sm:$0x1] }
 0x12b   :  { %1110 = vpow2.f32 %v671_v61  ;;  %v679_v35 = vmul.f32 1.442695, %v635_v10  ;;  %v638_v54 = vsub.f32 %v1547_v12, %v1609_v62  ;;  %v681_v0 = vmul.f32 1.442695, %v636_v32 }
 0x12c   :  { %v926_v48 = vadd.f32 %v925_v27, %v895_v30  ;;  %1112 = vpow2.f32 %v673_v14  ;;  %v639_v42 = vsub.f32 %v1394_v26, %v1609_v62  ;;  %v683_v43 = vmul.f32 1.442695, %v637_v38 }
 0x12d   :  { %1114 = vpow2.f32 %v675_v56  ;;  %v640_v2 = vsub.f32 %v1416_v40, %v1609_v62  ;;  %v685_v21 = vmul.f32 1.442695, %v638_v54  ;;  %v641_v3 = vsub.f32 %v1392_v25, %v1609_v62 }
 0x12e   :  { %v927_v1 = vrot.slane %v926_v48, 4  ;;  %1116 = vpow2.f32 %v677_v31  ;;  %v687_v59 = vmul.f32 1.442695, %v639_v42  ;;  %v642_v61 = vsub.f32 %v1409_v34, %v1609_v62 }
 0x12f   :  { %1118 = vpow2.f32 %v679_v35  ;;  %v689_v63 = vmul.f32 1.442695, %v640_v2  ;;  %v643_v16 = vsub.f32 %v1442_v60, %v1609_v62  ;;  %v691_v14 = vmul.f32 1.442695, %v641_v3 }
 0x130   :  { %v1095_v19 = vpop.eup %1094  ;;  %v928_v9 = vadd.f32 %v927_v1, %v926_v48  ;;  %1120 = vpow2.f32 %v681_v0  ;;  %v693_v30 = vmul.f32 1.442695, %v642_v61  ;;  %v645_v56 = vsub.f32 %v1428_v49, %v1609_v62 }
 0x131   :  { %v1097_v4 = vpop.eup %1096  ;;  %1122 = vpow2.f32 %v683_v43  ;;  %v646_v60 = vsub.f32 %v1447_v13, %v1609_v62  ;;  %v648_v49 = vsub.f32 %v1508_v17, %v1609_v62  ;;  %v649_v13 = vsub.f32 %v1471_v36, %v1609_v62 }
 0x132   :  { %v719_v11 = vadd.f32 %v1097_v4, %v1095_v19  ;;  %v1099_v8 = vpop.eup %1098  ;;  %v929_v5 = vrot.slane %v928_v9, 2  ;;  %1124 = vpow2.f32 %v685_v21  ;;  %v644_v4 = vsub.f32 %v1464_v28, %v1609_v62 }
 0x133   :  { %v1101_v39 = vpop.eup %1100  ;;  %1126 = vpow2.f32 %v687_v59  ;;  %v647_v28 = vsub.f32 %v1485_v51, %v1609_v62  ;;  %v699_v1 = vmul.f32 1.442695, %v645_v56  ;;  %v701_v35 = vmul.f32 1.442695, %v646_v60 }
 0x134   :  { %v720_v24 = vadd.f32 %v1099_v8, %v719_v11  ;;  %v1103_v47 = vpop.eup %1102  ;;  %v930_v29 = vadd.f32 %v929_v5, %v928_v9  ;;  %1128 = vpow2.f32 %v689_v63  ;;  %v695_v11 = vmul.f32 1.442695, %v643_v16 }
 0x135   :  { %v1105_v37 = vpop.eup %1104  ;;  %1130 = vpow2.f32 %v691_v14  ;;  %v697_v32 = vmul.f32 1.442695, %v644_v4  ;;  %v650_v51 = vsub.f32 %v1493_v58, %v1609_v62  ;;  %v651_v17 = vsub.f32 %v1555_v22, %v1609_v62 }
 0x136   :  { %v721_v6 = vadd.f32 %v1101_v39, %v720_v24  ;;  %v1107_v44 = vpop.eup %1106  ;;  %v931_v12 = vrot.slane %v930_v29, 1  ;;  %1132 = vpow2.f32 %v693_v30  ;;  %v707_v42 = vmul.f32 1.442695, %v649_v13  ;;  %v945_v13 = vld [vmem:[%s1709_s4] sm:$0x1] }
 0x137   :  { %v1109_v53 = vpop.eup %1108  ;;  %1134 = vpow2.f32 %v695_v11  ;;  %v652_v36 = vsub.f32 %v1579_v45, %v1609_v62  ;;  %v653_v58 = vsub.f32 %v1537_v52, %v1609_v62  ;;  %v711_v21 = vmul.f32 1.442695, %v651_v17 }
 0x138   :  { %v722_v57 = vadd.f32 %v1103_v47, %v721_v6  ;;  %v932_v18 = vadd.f32 %v931_v12, %v930_v29  ;;  %v1111_v46 = vpop.eup %1110  ;;  %1136 = vpow2.f32 %v697_v32  ;;  %v703_v47 = vmul.f32 1.442695, %v647_v28  ;;  %v615_v28 = vld [vmem:[#allocation3] sm:$0x1] }
 0x139   :  { %v1113_v19 = vpop.eup %1112  ;;  %1138 = vpow2.f32 %v699_v1  ;;  %v709_v29 = vmul.f32 1.442695, %v650_v51  ;;  %v654_v22 = vsub.f32 %v1569_v20, %v1609_v62  ;;  %v715_v45 = vmul.f32 1.442695, %v653_v58 }
 0x13a   :  { %v723_v23 = vadd.f32 %v1105_v37, %v722_v57  ;;  %v933_v15 = vadd.f32 %v932_v18, %v826_v33  ;;  %v1115_v27 = vpop.eup %1114  ;;  %1140 = vpow2.f32 %v701_v35  ;;  %v705_v57 = vmul.f32 1.442695, %v648_v49  ;;  %v939_v35 = vld [vmem:[#allocation2] sm:$0x1] }
 0x13b   :  { %v1117_v34 = vpop.eup %1116  ;;  %1142 = vpow2.f32 %v703_v47  ;;  %v717_v18 = vmul.f32 1.442695, %v654_v22  ;;  %v613_v14 = vmul.f32 1.442695, %v612_v55 }
 0x13c   :  { %v724_v7 = vadd.f32 %v1107_v44, %v723_v23  ;;  %934 = vst [vmem:[#allocation4] sm:$0x1] %v933_v15  ;;  %v1119_v8 = vpop.eup %1118  ;;  %1144 = vpow2.f32 %v705_v57 }
 0x13d   :  { %v1121_v24 = vpop.eup %1120  ;;  %1146 = vpow2.f32 %v707_v42 }
 0x13e   :  { %v725_v26 = vadd.f32 %v1109_v53, %v724_v7  ;;  %v1123_v38 = vpop.eup %1122  ;;  %1148 = vpow2.f32 %v709_v29  ;;  %v713_v53 = vmul.f32 1.442695, %v652_v36 }
 0x13f   :  { %v1125_v9 = vpop.eup %1124  ;;  %1150 = vpow2.f32 %v711_v21 }
 0x140   :  { %v726_v40 = vadd.f32 %v1111_v46, %v725_v26  ;;  %v1127_v0 = vpop.eup %1126  ;;  %1152 = vpow2.f32 %v713_v53 }
 0x141   :  { %v1129_v37 = vpop.eup %1128  ;;  %1154 = vpow2.f32 %v715_v45 }
 0x142   :  { %v727_v25 = vadd.f32 %v1113_v19, %v726_v40  ;;  %v1131_v23 = vpop.eup %1130  ;;  %1156 = vpow2.f32 %v717_v18 }
 0x143   :  { %v1133_v2 = vpop.eup %1132  ;;  %1158 = vpow2.f32 %v613_v14 }
 0x144   :  { %v728_v10 = vadd.f32 %v1115_v27, %v727_v25  ;;  %v1135_v12 = vpop.eup %1134 }
 0x145   :  { %v1137_v33 = vpop.eup %1136 }
 0x146   :  { %v729_v48 = vadd.f32 %v1117_v34, %v728_v10  ;;  %v1139_v26 = vpop.eup %1138 }
 0x147   :  { %v1141_v61 = vpop.eup %1140 }
 0x148   :  { %v730_v31 = vadd.f32 %v1119_v8, %v729_v48  ;;  %v1143_v63 = vpop.eup %1142 }
 0x149   :  { %v1145_v15 = vpop.eup %1144 }
 0x14a   :  { %v731_v39 = vadd.f32 %v1121_v24, %v730_v31  ;;  %v1147_v20 = vpop.eup %1146 }
 0x14b   :  { %v1149_v16 = vpop.eup %1148 }
 0x14c   :  { %v732_v6 = vadd.f32 %v1123_v38, %v731_v39  ;;  %v1151_v27 = vpop.eup %1150 }
 0x14d   :  { %v1153_v30 = vpop.eup %1152 }
 0x14e   :  { %v733_v54 = vadd.f32 %v1125_v9, %v732_v6  ;;  %v1155_v34 = vpop.eup %1154  ;;  %v938_v9 = vld [vmem:[#allocation4] sm:$0x1] }
 0x14f   :  { %v1157_v11 = vpop.eup %1156 }
 0x150   :  { %v734_v5 = vadd.f32 %v1127_v0, %v733_v54  ;;  %v1159_v24 = vpop.eup %1158 }
 0x151   :  { %v616_v39 = vmul.f32 %v1159_v24, %v615_v28 }
 0x152   :  { %v735_v43 = vadd.f32 %v1129_v37, %v734_v5 }
 0x154   :  { %v736_v44 = vadd.f32 %v1131_v23, %v735_v43 }
 0x156   :  { %v737_v7 = vadd.f32 %v1133_v2, %v736_v44 }
 0x158   :  { %v738_v3 = vadd.f32 %v1135_v12, %v737_v7 }
 0x15a   :  { %v739_v59 = vadd.f32 %v1137_v33, %v738_v3 }
 0x15c   :  { %v740_v46 = vadd.f32 %v1139_v26, %v739_v59 }
 0x15e   :  { %v741_v52 = vadd.f32 %v1141_v61, %v740_v46 }
 0x160   :  { %v742_v40 = vadd.f32 %v1143_v63, %v741_v52 }
 0x162   :  { %v743_v19 = vadd.f32 %v1145_v15, %v742_v40 }
 0x164   :  { %v744_v62 = vadd.f32 %v1147_v20, %v743_v19 }
 0x166   :  { %v745_v25 = vadd.f32 %v1149_v16, %v744_v62 }
 0x168   :  { %v746_v4 = vadd.f32 %v1151_v27, %v745_v25 }
 0x16a   :  { %v747_v10 = vadd.f32 %v1153_v30, %v746_v4 }
 0x16c   :  { %v748_v56 = vadd.f32 %v1155_v34, %v747_v10 }
 0x16e   :  { %v749_v48 = vadd.f32 %v1157_v11, %v748_v56 }
 0x170   :  { %v750_v8 = vrot.slane %v749_v48, 4 }
 0x172   :  { %v751_v60 = vadd.f32 %v750_v8, %v749_v48 }
 0x174   :  { %v752_v32 = vrot.slane %v751_v60, 2 }
 0x176   :  { %v753_v31 = vadd.f32 %v752_v32, %v751_v60 }
 0x178   :  { %v754_v1 = vrot.slane %v753_v31, 1 }
 0x17a   :  { %v755_v41 = vadd.f32 %v754_v1, %v753_v31 }
 0x17c   :  { %v756_v50 = vadd.f32 %v755_v41, %v616_v39 }
 0x17e   :  { %757 = vst [vmem:[#allocation3] sm:$0x1] %v756_v50 }
 0x185   :  { %v940_v55 = vld [vmem:[#allocation3] sm:$0x1] }
 0x186   :  { %1160 = vlog2.f32 %v940_v55 }
 0x193   :  { %v1161_v38 = vpop.eup %1160 }
 0x194   :  { %v942_v49 = vmul.f32 0.6931472, %v1161_v38 }
 0x196   :  { %v943_v6 = vadd.f32 %v942_v49, %v939_v35 }
 0x198   :  { %v944_v47 = vsub.f32 %v938_v9, %v943_v6 }
 0x19a   :  { %v946_v54 = vmul.f32 %v945_v13, %v944_v47 }
 0x19c   :  { %947 = vst [vmem:[%s1710_s5] sm:$0x1] %v946_v54 }

</bundles_post_ra>
